<compile_context>
chip_gen: v5e
topology: v5e:2x2
jax: 0.10.0
libtpu: 0.0.40
codegen_flags: <defaults>
</compile_context>

<pallas_src>
import math
import functools

import jax
import jax.numpy as jnp
from jax import lax
from jax.experimental import pallas as pl
from jax.experimental.pallas import tpu as pltpu


# ------------------------------ fused kernel --------------------------------

def _mha_kernel(q_ref, k_ref, v_ref,
                wq_ref, bq_ref, wk_ref, bk_ref, wv_ref, bv_ref,
                wo_ref, bo_ref,
                o_ref,
                qp_ref, kp_ref, vp_ref, acc_ref, m_ref, l_ref,
                *, num_heads, d_k, scale):
    """Grid = (batch, q_tile, kv_tile); kv_tile innermost (reduction)."""
    ki = pl.program_id(2)
    last_kv = pl.num_programs(2) - 1

    # ---- first KV step for this (b, q-tile): project q, init flash state ----
    @pl.when(ki == 0)
    def _init():
        qp = jnp.dot(q_ref[...].astype(jnp.bfloat16), wq_ref[...],
                     preferred_element_type=jnp.float32) + bq_ref[...]
        # 1/sqrt(d_k) folded into projected q (O(TQ*D), not O(TQ*TKV) per tile)
        qp_ref[...] = (qp * scale).astype(jnp.bfloat16)
        m_ref[...] = jnp.full_like(m_ref, -jnp.inf)
        l_ref[...] = jnp.zeros_like(l_ref)
        acc_ref[...] = jnp.zeros_like(acc_ref)

    # ---- project the current KV tile, full width (lane-dense MXU matmuls) ----
    kp_ref[...] = (jnp.dot(k_ref[...].astype(jnp.bfloat16), wk_ref[...],
                           preferred_element_type=jnp.float32)
                   + bk_ref[...]).astype(jnp.bfloat16)
    vp_ref[...] = (jnp.dot(v_ref[...].astype(jnp.bfloat16), wv_ref[...],
                           preferred_element_type=jnp.float32)
                   + bv_ref[...]).astype(jnp.bfloat16)

    # ---- per-head online-softmax update (only per-head slices live) ----------
    for h in range(num_heads):
        c0, c1 = h * d_k, (h + 1) * d_k
        qh = qp_ref[:, c0:c1]                       # [TQ,  d_k] bf16 (scaled)
        kh = kp_ref[:, c0:c1]                       # [TKV, d_k] bf16
        vh = vp_ref[:, c0:c1]                       # [TKV, d_k] bf16

        # scores = qh @ kh^T as a last-dim contraction (no XLU transpose)
        s = lax.dot_general(qh, kh, (((1,), (1,)), ((), ())),
                            preferred_element_type=jnp.float32)   # [TQ, TKV]

        m_old = m_ref[:, h:h + 1]                                  # [TQ, 1]
        m_new = jnp.maximum(m_old, jnp.max(s, axis=-1, keepdims=True))
        alpha = jnp.exp(m_old - m_new)                             # f32
        p = jnp.exp(s - m_new)                                     # f32
        l_ref[:, h:h + 1] = alpha * l_ref[:, h:h + 1] + jnp.sum(
            p, axis=-1, keepdims=True)
        acc_ref[:, c0:c1] = alpha * acc_ref[:, c0:c1] + jnp.dot(
            p.astype(jnp.bfloat16), vh, preferred_element_type=jnp.float32)
        m_ref[:, h:h + 1] = m_new

    # ---- last KV step: normalize, then ONE dense output projection -----------
    @pl.when(ki == last_kv)
    def _finalize():
        for h in range(num_heads):
            c0, c1 = h * d_k, (h + 1) * d_k
            inv_l = pl.reciprocal(l_ref[:, h:h + 1], approx=True)  # EUP slot
            acc_ref[:, c0:c1] = acc_ref[:, c0:c1] * inv_l
        out = jnp.dot(acc_ref[...].astype(jnp.bfloat16), wo_ref[...],
                      preferred_element_type=jnp.float32) + bo_ref[...]
        o_ref[...] = out.astype(o_ref.dtype)


# ----------------------------- module wrapper --------------------------------

def init_mha_params(key, d_model):
    """Deterministic parameter init mimicking 4x nn.Linear(d_model, d_model)."""
    ks = jax.random.split(key, 8)
    bound = 1.0 / math.sqrt(d_model)

    def lin(kw, kb):
        # PyTorch weight is [out, in]; store transposed [in, out] for x @ w.
        w = jax.random.uniform(kw, (d_model, d_model), jnp.float32, -bound, bound)
        b = jax.random.uniform(kb, (1, d_model), jnp.float32, -bound, bound)
        return w, b

    wq, bq = lin(ks[0], ks[1])
    wk, bk = lin(ks[2], ks[3])
    wv, bv = lin(ks[4], ks[5])
    wo, bo = lin(ks[6], ks[7])
    return dict(wq=wq, bq=bq, wk=wk, bk=bk, wv=wv, bv=bv, wo=wo, bo=bo)


def multi_head_attention(q, k, v, params, num_heads):
    """Forward pass equivalent to MultiHeadAttention.forward(q, k, v, mask=None)."""
    B, S, D = q.shape
    assert D % num_heads == 0
    d_k = D // num_heads
    scale = 1.0 / math.sqrt(d_k)

    # Tile sizes: MXU-friendly (>=128) at production sequence lengths, whole
    # sequence at small demo shapes.
    TQ = min(S, 128)
    TKV = min(S, 128)
    assert S % TQ == 0 and S % TKV == 0

    q_spec = pl.BlockSpec((None, TQ, D), lambda b, qi, ki: (b, qi, 0))
    kv_spec = pl.BlockSpec((None, TKV, D), lambda b, qi, ki: (b, ki, 0))
    w_spec = pl.BlockSpec((D, D), lambda b, qi, ki: (0, 0))   # resident weights
    b_spec = pl.BlockSpec((1, D), lambda b, qi, ki: (0, 0))   # resident biases
    out_spec = pl.BlockSpec((None, TQ, D), lambda b, qi, ki: (b, qi, 0))

    kernel = functools.partial(_mha_kernel,
                               num_heads=num_heads, d_k=d_k, scale=scale)

    # Weights as bf16 (MXU operands + halved VMEM residency); biases stay f32.
    bf16 = jnp.bfloat16
    return pl.pallas_call(
        kernel,
        out_shape=jax.ShapeDtypeStruct((B, S, D), jnp.float32),
        grid=(B, S // TQ, S // TKV),
        in_specs=[q_spec, kv_spec, kv_spec,
                  w_spec, b_spec,      # wq, bq
                  w_spec, b_spec,      # wk, bk
                  w_spec, b_spec,      # wv, bv
                  w_spec, b_spec],     # wo, bo
        out_specs=out_spec,
        scratch_shapes=[
            pltpu.VMEM((TQ, D), jnp.bfloat16),        # projected, scaled q tile
            pltpu.VMEM((TKV, D), jnp.bfloat16),       # projected k tile
            pltpu.VMEM((TKV, D), jnp.bfloat16),       # projected v tile
            pltpu.VMEM((TQ, D), jnp.float32),         # ctx accumulator (all heads)
            pltpu.VMEM((TQ, num_heads), jnp.float32),  # running max m (per head)
            pltpu.VMEM((TQ, num_heads), jnp.float32),  # running sum l (per head)
        ],
        compiler_params=pltpu.CompilerParams(
            # batch & q-tile sharded across TensorCores; KV axis is the
            # reduction (innermost) so the output/scratch stay resident.
            dimension_semantics=("parallel", "parallel", "arbitrary"),
            # raise the scoped-VMEM limit above the 16 MiB v5e default; size
            # this up further for production d_model / tile choices.
            vmem_limit_bytes=32 * 1024 * 1024,
        ),
    )(q, k, v,
      params["wq"].astype(bf16), params["bq"],
      params["wk"].astype(bf16), params["bk"],
      params["wv"].astype(bf16), params["bv"],
      params["wo"].astype(bf16), params["bo"])


# --------------------------------- main ---------------------------------------

def _reference(q, k, v, params, num_heads):
    """Pure-JAX f32 reference of the PyTorch forward (mask=None)."""
    B, S, D = q.shape
    d_k = D // num_heads

    def proj(x, w, b):
        y = x.reshape(B * S, D) @ w + b
        return y.reshape(B, S, num_heads, d_k).transpose(0, 2, 1, 3)

    qh = proj(q, params["wq"], params["bq"])
    kh = proj(k, params["wk"], params["bk"])
    vh = proj(v, params["wv"], params["bv"])
    scores = jnp.einsum("bhqd,bhkd->bhqk", qh, kh) / math.sqrt(d_k)
    attn = jax.nn.softmax(scores, axis=-1)
    ctx = jnp.einsum("bhqk,bhkd->bhqd", attn, vh)
    ctx = ctx.transpose(0, 2, 1, 3).reshape(B * S, D)
    return (ctx @ params["wo"] + params["bo"]).reshape(B, S, D)


if __name__ == "__main__":
    B, S, D, H = 2, 8, 32, 4  # batch, seq, d_model, num_heads  (d_k = 8)

    key = jax.random.PRNGKey(0)
    kq, kk, kv, kp = jax.random.split(key, 4)
    q = jax.random.normal(kq, (B, S, D), jnp.float32)
    k = jax.random.normal(kk, (B, S, D), jnp.float32)
    v = jax.random.normal(kv, (B, S, D), jnp.float32)
    params = init_mha_params(kp, D)

    out = multi_head_attention(q, k, v, params, H)
    out = jax.block_until_ready(out)

    ref = _reference(q, k, v, params, H)
    assert out.shape == (B, S, D)
    # tolerance covers bf16 MXU operands (f32 accumulation) and the
    # approximate (EUP) reciprocal used in the softmax normalization
    assert jnp.allclose(out, ref, atol=2e-2, rtol=2e-2), "mismatch vs reference"

    print("KERNEL_OK")
</pallas_src>

<mosaic_0001>
module attributes {stable_mosaic.version = 11 : i64} {
  func.func @_mha_kernel(%arg0: i32, %arg1: i32, %arg2: i32, %arg3: memref<1x8x32xf32, #tpu.memory_space<vmem>>, %arg4: memref<1x8x32xf32, #tpu.memory_space<vmem>>, %arg5: memref<1x8x32xf32, #tpu.memory_space<vmem>>, %arg6: memref<32x32xbf16, #tpu.memory_space<vmem>>, %arg7: memref<1x32xf32, #tpu.memory_space<vmem>>, %arg8: memref<32x32xbf16, #tpu.memory_space<vmem>>, %arg9: memref<1x32xf32, #tpu.memory_space<vmem>>, %arg10: memref<32x32xbf16, #tpu.memory_space<vmem>>, %arg11: memref<1x32xf32, #tpu.memory_space<vmem>>, %arg12: memref<32x32xbf16, #tpu.memory_space<vmem>>, %arg13: memref<1x32xf32, #tpu.memory_space<vmem>>, %arg14: memref<1x8x32xf32, #tpu.memory_space<vmem>>, %arg15: memref<8x32xbf16, #tpu.memory_space<vmem>>, %arg16: memref<8x32xbf16, #tpu.memory_space<vmem>>, %arg17: memref<8x32xbf16, #tpu.memory_space<vmem>>, %arg18: memref<8x32xf32, #tpu.memory_space<vmem>>, %arg19: memref<8x4xf32, #tpu.memory_space<vmem>>, %arg20: memref<8x4xf32, #tpu.memory_space<vmem>>) attributes {dimension_semantics = [#tpu.dimension_semantics<parallel>, #tpu.dimension_semantics<parallel>, #tpu.dimension_semantics<arbitrary>], iteration_bounds = array<i64: 2, 1, 1>, scalar_prefetch = 0 : i64, scratch_operands = 6 : i64, tpu.core_type = #tpu.core_type<tc>, window_params = [{transform_indices = @transform_0, window_bounds = array<i64: 1, 8, 32>}, {transform_indices = @transform_1, window_bounds = array<i64: 1, 8, 32>}, {transform_indices = @transform_2, window_bounds = array<i64: 1, 8, 32>}, {pipeline_mode = #tpu.pipeline_mode<synchronous>, transform_indices = @transform_3, window_bounds = array<i64: 32, 32>}, {pipeline_mode = #tpu.pipeline_mode<synchronous>, transform_indices = @transform_4, window_bounds = array<i64: 1, 32>}, {pipeline_mode = #tpu.pipeline_mode<synchronous>, transform_indices = @transform_5, window_bounds = array<i64: 32, 32>}, {pipeline_mode = #tpu.pipeline_mode<synchronous>, transform_indices = @transform_6, window_bounds = array<i64: 1, 32>}, {pipeline_mode = #tpu.pipeline_mode<synchronous>, transform_indices = @transform_7, window_bounds = array<i64: 32, 32>}, {pipeline_mode = #tpu.pipeline_mode<synchronous>, transform_indices = @transform_8, window_bounds = array<i64: 1, 32>}, {pipeline_mode = #tpu.pipeline_mode<synchronous>, transform_indices = @transform_9, window_bounds = array<i64: 32, 32>}, {pipeline_mode = #tpu.pipeline_mode<synchronous>, transform_indices = @transform_10, window_bounds = array<i64: 1, 32>}, {transform_indices = @transform_11, window_bounds = array<i64: 1, 8, 32>}]} {
    %c0_i32 = arith.constant 0 : i32
    %0 = arith.cmpi eq, %arg2, %c0_i32 : i32
    %1 = arith.extui %0 : i1 to i32
    %c0_i32_0 = arith.constant 0 : i32
    %2 = arith.cmpi ne, %1, %c0_i32_0 : i32
    scf.if %2 {
      %c0_103 = arith.constant 0 : index
      %c0_104 = arith.constant 0 : index
      %c0_105 = arith.constant 0 : index
      %134 = vector.load %arg3[%c0_103, %c0_104, %c0_105] : memref<1x8x32xf32, #tpu.memory_space<vmem>>, vector<1x8x32xf32>
      %135 = vector.shape_cast %134 : vector<1x8x32xf32> to vector<8x32xf32>
      %136 = arith.truncf %135 : vector<8x32xf32> to vector<8x32xbf16>
      %c0_106 = arith.constant 0 : index
      %c0_107 = arith.constant 0 : index
      %137 = vector.load %arg6[%c0_106, %c0_107] : memref<32x32xbf16, #tpu.memory_space<vmem>>, vector<32x32xbf16>
      %cst_108 = arith.constant dense<0.000000e+00> : vector<8x32xf32>
      %138 = tpu.matmul %136, %137, %cst_108 {dimension_numbers = #tpu.dot_dimension_numbers<[1], [0], [0], [1], [0, 0, 1, 1], [], []>} : vector<8x32xbf16>, vector<32x32xbf16>, vector<8x32xf32> -> vector<8x32xf32>
      %c0_109 = arith.constant 0 : index
      %c0_110 = arith.constant 0 : index
      %139 = vector.load %arg7[%c0_109, %c0_110] : memref<1x32xf32, #tpu.memory_space<vmem>>, vector<1x32xf32>
      %140 = vector.broadcast %139 : vector<1x32xf32> to vector<8x32xf32>
      %141 = arith.addf %138, %140 : vector<8x32xf32>
      %cst_111 = arith.constant 0.353553385 : f32
      %142 = vector.broadcast %cst_111 : f32 to vector<8x32xf32>
      %143 = arith.mulf %141, %142 : vector<8x32xf32>
      %144 = arith.truncf %143 : vector<8x32xf32> to vector<8x32xbf16>
      %c0_112 = arith.constant 0 : index
      %c0_113 = arith.constant 0 : index
      %145 = vector.load %arg15[%c0_112, %c0_113] : memref<8x32xbf16, #tpu.memory_space<vmem>>, vector<8x32xbf16>
      tpu.vector_store %arg15[%c0_112, %c0_113], %144 {strides = array<i32>} : memref<8x32xbf16, #tpu.memory_space<vmem>>, vector<8x32xbf16>,
      %cst_114 = arith.constant 0xFF800000 : f32
      %146 = vector.broadcast %cst_114 : f32 to vector<8x4xf32>
      %c0_115 = arith.constant 0 : index
      %c0_116 = arith.constant 0 : index
      %147 = vector.load %arg19[%c0_115, %c0_116] : memref<8x4xf32, #tpu.memory_space<vmem>>, vector<8x4xf32>
      tpu.vector_store %arg19[%c0_115, %c0_116], %146 {strides = array<i32>} : memref<8x4xf32, #tpu.memory_space<vmem>>, vector<8x4xf32>,
      %cst_117 = arith.constant 0.000000e+00 : f32
      %148 = vector.broadcast %cst_117 : f32 to vector<8x4xf32>
      %c0_118 = arith.constant 0 : index
      %c0_119 = arith.constant 0 : index
      %149 = vector.load %arg20[%c0_118, %c0_119] : memref<8x4xf32, #tpu.memory_space<vmem>>, vector<8x4xf32>
      tpu.vector_store %arg20[%c0_118, %c0_119], %148 {strides = array<i32>} : memref<8x4xf32, #tpu.memory_space<vmem>>, vector<8x4xf32>,
      %cst_120 = arith.constant 0.000000e+00 : f32
      %150 = vector.broadcast %cst_120 : f32 to vector<8x32xf32>
      %c0_121 = arith.constant 0 : index
      %c0_122 = arith.constant 0 : index
      %151 = vector.load %arg18[%c0_121, %c0_122] : memref<8x32xf32, #tpu.memory_space<vmem>>, vector<8x32xf32>
      tpu.vector_store %arg18[%c0_121, %c0_122], %150 {strides = array<i32>} : memref<8x32xf32, #tpu.memory_space<vmem>>, vector<8x32xf32>,
    } else {
    }
    %c0 = arith.constant 0 : index
    %c0_1 = arith.constant 0 : index
    %c0_2 = arith.constant 0 : index
    %3 = vector.load %arg4[%c0, %c0_1, %c0_2] : memref<1x8x32xf32, #tpu.memory_space<vmem>>, vector<1x8x32xf32>
    %4 = vector.shape_cast %3 : vector<1x8x32xf32> to vector<8x32xf32>
    %5 = arith.truncf %4 : vector<8x32xf32> to vector<8x32xbf16>
    %c0_3 = arith.constant 0 : index
    %c0_4 = arith.constant 0 : index
    %6 = vector.load %arg8[%c0_3, %c0_4] : memref<32x32xbf16, #tpu.memory_space<vmem>>, vector<32x32xbf16>
    %cst = arith.constant dense<0.000000e+00> : vector<8x32xf32>
    %7 = tpu.matmul %5, %6, %cst {dimension_numbers = #tpu.dot_dimension_numbers<[1], [0], [0], [1], [0, 0, 1, 1], [], []>} : vector<8x32xbf16>, vector<32x32xbf16>, vector<8x32xf32> -> vector<8x32xf32>
    %c0_5 = arith.constant 0 : index
    %c0_6 = arith.constant 0 : index
    %8 = vector.load %arg9[%c0_5, %c0_6] : memref<1x32xf32, #tpu.memory_space<vmem>>, vector<1x32xf32>
    %9 = vector.broadcast %8 : vector<1x32xf32> to vector<8x32xf32>
    %10 = arith.addf %7, %9 : vector<8x32xf32>
    %11 = arith.truncf %10 : vector<8x32xf32> to vector<8x32xbf16>
    %c0_7 = arith.constant 0 : index
    %c0_8 = arith.constant 0 : index
    %12 = vector.load %arg16[%c0_7, %c0_8] : memref<8x32xbf16, #tpu.memory_space<vmem>>, vector<8x32xbf16>
    tpu.vector_store %arg16[%c0_7, %c0_8], %11 {strides = array<i32>} : memref<8x32xbf16, #tpu.memory_space<vmem>>, vector<8x32xbf16>,
    %c0_9 = arith.constant 0 : index
    %c0_10 = arith.constant 0 : index
    %c0_11 = arith.constant 0 : index
    %13 = vector.load %arg5[%c0_9, %c0_10, %c0_11] : memref<1x8x32xf32, #tpu.memory_space<vmem>>, vector<1x8x32xf32>
    %14 = vector.shape_cast %13 : vector<1x8x32xf32> to vector<8x32xf32>
    %15 = arith.truncf %14 : vector<8x32xf32> to vector<8x32xbf16>
    %c0_12 = arith.constant 0 : index
    %c0_13 = arith.constant 0 : index
    %16 = vector.load %arg10[%c0_12, %c0_13] : memref<32x32xbf16, #tpu.memory_space<vmem>>, vector<32x32xbf16>
    %cst_14 = arith.constant dense<0.000000e+00> : vector<8x32xf32>
    %17 = tpu.matmul %15, %16, %cst_14 {dimension_numbers = #tpu.dot_dimension_numbers<[1], [0], [0], [1], [0, 0, 1, 1], [], []>} : vector<8x32xbf16>, vector<32x32xbf16>, vector<8x32xf32> -> vector<8x32xf32>
    %c0_15 = arith.constant 0 : index
    %c0_16 = arith.constant 0 : index
    %18 = vector.load %arg11[%c0_15, %c0_16] : memref<1x32xf32, #tpu.memory_space<vmem>>, vector<1x32xf32>
    %19 = vector.broadcast %18 : vector<1x32xf32> to vector<8x32xf32>
    %20 = arith.addf %17, %19 : vector<8x32xf32>
    %21 = arith.truncf %20 : vector<8x32xf32> to vector<8x32xbf16>
    %c0_17 = arith.constant 0 : index
    %c0_18 = arith.constant 0 : index
    %22 = vector.load %arg17[%c0_17, %c0_18] : memref<8x32xbf16, #tpu.memory_space<vmem>>, vector<8x32xbf16>
    tpu.vector_store %arg17[%c0_17, %c0_18], %21 {strides = array<i32>} : memref<8x32xbf16, #tpu.memory_space<vmem>>, vector<8x32xbf16>,
    %c0_19 = arith.constant 0 : index
    %c0_20 = arith.constant 0 : index
    %23 = vector.load %arg15[%c0_19, %c0_20] : memref<8x32xbf16, #tpu.memory_space<vmem>>, vector<8x8xbf16>
    %c0_21 = arith.constant 0 : index
    %c0_22 = arith.constant 0 : index
    %24 = vector.load %arg16[%c0_21, %c0_22] : memref<8x32xbf16, #tpu.memory_space<vmem>>, vector<8x8xbf16>
    %c0_23 = arith.constant 0 : index
    %c0_24 = arith.constant 0 : index
    %25 = vector.load %arg17[%c0_23, %c0_24] : memref<8x32xbf16, #tpu.memory_space<vmem>>, vector<8x8xbf16>
    %cst_25 = arith.constant dense<0.000000e+00> : vector<8x8xf32>
    %26 = tpu.matmul %23, %24, %cst_25 {dimension_numbers = #tpu.dot_dimension_numbers<[1], [1], [0], [0], [0, 0, 1, 0], [], []>} : vector<8x8xbf16>, vector<8x8xbf16>, vector<8x8xf32> -> vector<8x8xf32>
    %c0_26 = arith.constant 0 : index
    %c0_27 = arith.constant 0 : index
    %27 = vector.load %arg19[%c0_26, %c0_27] : memref<8x4xf32, #tpu.memory_space<vmem>>, vector<8x1xf32>
    %cst_28 = arith.constant dense<0xFF800000> : vector<8xf32>
    %28 = vector.multi_reduction <maximumf>, %26, %cst_28 [1] : vector<8x8xf32> to vector<8xf32>
    %29 = vector.shape_cast %28 : vector<8xf32> to vector<8x1xf32>
    %30 = arith.maximumf %27, %29 : vector<8x1xf32>
    %31 = arith.subf %27, %30 : vector<8x1xf32>
    %32 = math.exp %31 : vector<8x1xf32>
    %33 = vector.broadcast %30 : vector<8x1xf32> to vector<8x8xf32>
    %34 = arith.subf %26, %33 : vector<8x8xf32>
    %35 = math.exp %34 : vector<8x8xf32>
    %c0_29 = arith.constant 0 : index
    %c0_30 = arith.constant 0 : index
    %36 = vector.load %arg20[%c0_29, %c0_30] : memref<8x4xf32, #tpu.memory_space<vmem>>, vector<8x1xf32>
    %37 = arith.mulf %32, %36 : vector<8x1xf32>
    %cst_31 = arith.constant dense<0.000000e+00> : vector<8xf32>
    %38 = vector.multi_reduction <add>, %35, %cst_31 [1] : vector<8x8xf32> to vector<8xf32>
    %39 = vector.shape_cast %38 : vector<8xf32> to vector<8x1xf32>
    %40 = arith.addf %37, %39 : vector<8x1xf32>
    %c0_32 = arith.constant 0 : index
    %c0_33 = arith.constant 0 : index
    %41 = vector.load %arg20[%c0_32, %c0_33] : memref<8x4xf32, #tpu.memory_space<vmem>>, vector<8x1xf32>
    tpu.vector_store %arg20[%c0_32, %c0_33], %40 {strides = array<i32>} : memref<8x4xf32, #tpu.memory_space<vmem>>, vector<8x1xf32>,
    %c0_34 = arith.constant 0 : index
    %c0_35 = arith.constant 0 : index
    %42 = vector.load %arg18[%c0_34, %c0_35] : memref<8x32xf32, #tpu.memory_space<vmem>>, vector<8x8xf32>
    %43 = vector.broadcast %32 : vector<8x1xf32> to vector<8x8xf32>
    %44 = arith.mulf %43, %42 : vector<8x8xf32>
    %45 = arith.truncf %35 : vector<8x8xf32> to vector<8x8xbf16>
    %cst_36 = arith.constant dense<0.000000e+00> : vector<8x8xf32>
    %46 = tpu.matmul %45, %25, %cst_36 {dimension_numbers = #tpu.dot_dimension_numbers<[1], [0], [0], [1], [0, 0, 1, 1], [], []>} : vector<8x8xbf16>, vector<8x8xbf16>, vector<8x8xf32> -> vector<8x8xf32>
    %47 = arith.addf %44, %46 : vector<8x8xf32>
    %c0_37 = arith.constant 0 : index
    %c0_38 = arith.constant 0 : index
    %48 = vector.load %arg18[%c0_37, %c0_38] : memref<8x32xf32, #tpu.memory_space<vmem>>, vector<8x8xf32>
    tpu.vector_store %arg18[%c0_37, %c0_38], %47 {strides = array<i32>} : memref<8x32xf32, #tpu.memory_space<vmem>>, vector<8x8xf32>,
    %c0_39 = arith.constant 0 : index
    %c0_40 = arith.constant 0 : index
    %49 = vector.load %arg19[%c0_39, %c0_40] : memref<8x4xf32, #tpu.memory_space<vmem>>, vector<8x1xf32>
    tpu.vector_store %arg19[%c0_39, %c0_40], %30 {strides = array<i32>} : memref<8x4xf32, #tpu.memory_space<vmem>>, vector<8x1xf32>,
    %c0_41 = arith.constant 0 : index
    %c8 = arith.constant 8 : index
    %50 = vector.load %arg15[%c0_41, %c8] : memref<8x32xbf16, #tpu.memory_space<vmem>>, vector<8x8xbf16>
    %c0_42 = arith.constant 0 : index
    %c8_43 = arith.constant 8 : index
    %51 = vector.load %arg16[%c0_42, %c8_43] : memref<8x32xbf16, #tpu.memory_space<vmem>>, vector<8x8xbf16>
    %c0_44 = arith.constant 0 : index
    %c8_45 = arith.constant 8 : index
    %52 = vector.load %arg17[%c0_44, %c8_45] : memref<8x32xbf16, #tpu.memory_space<vmem>>, vector<8x8xbf16>
    %cst_46 = arith.constant dense<0.000000e+00> : vector<8x8xf32>
    %53 = tpu.matmul %50, %51, %cst_46 {dimension_numbers = #tpu.dot_dimension_numbers<[1], [1], [0], [0], [0, 0, 1, 0], [], []>} : vector<8x8xbf16>, vector<8x8xbf16>, vector<8x8xf32> -> vector<8x8xf32>
    %c0_47 = arith.constant 0 : index
    %c1 = arith.constant 1 : index
    %54 = vector.load %arg19[%c0_47, %c1] : memref<8x4xf32, #tpu.memory_space<vmem>>, vector<8x1xf32>
    %cst_48 = arith.constant dense<0xFF800000> : vector<8xf32>
    %55 = vector.multi_reduction <maximumf>, %53, %cst_48 [1] : vector<8x8xf32> to vector<8xf32>
    %56 = vector.shape_cast %55 : vector<8xf32> to vector<8x1xf32>
    %57 = arith.maximumf %54, %56 : vector<8x1xf32>
    %58 = arith.subf %54, %57 : vector<8x1xf32>
    %59 = math.exp %58 : vector<8x1xf32>
    %60 = vector.broadcast %57 : vector<8x1xf32> to vector<8x8xf32>
    %61 = arith.subf %53, %60 : vector<8x8xf32>
    %62 = math.exp %61 : vector<8x8xf32>
    %c0_49 = arith.constant 0 : index
    %c1_50 = arith.constant 1 : index
    %63 = vector.load %arg20[%c0_49, %c1_50] : memref<8x4xf32, #tpu.memory_space<vmem>>, vector<8x1xf32>
    %64 = arith.mulf %59, %63 : vector<8x1xf32>
    %cst_51 = arith.constant dense<0.000000e+00> : vector<8xf32>
    %65 = vector.multi_reduction <add>, %62, %cst_51 [1] : vector<8x8xf32> to vector<8xf32>
    %66 = vector.shape_cast %65 : vector<8xf32> to vector<8x1xf32>
    %67 = arith.addf %64, %66 : vector<8x1xf32>
    %c0_52 = arith.constant 0 : index
    %c1_53 = arith.constant 1 : index
    %68 = vector.load %arg20[%c0_52, %c1_53] : memref<8x4xf32, #tpu.memory_space<vmem>>, vector<8x1xf32>
    tpu.vector_store %arg20[%c0_52, %c1_53], %67 {strides = array<i32>} : memref<8x4xf32, #tpu.memory_space<vmem>>, vector<8x1xf32>,
    %c0_54 = arith.constant 0 : index
    %c8_55 = arith.constant 8 : index
    %69 = vector.load %arg18[%c0_54, %c8_55] : memref<8x32xf32, #tpu.memory_space<vmem>>, vector<8x8xf32>
    %70 = vector.broadcast %59 : vector<8x1xf32> to vector<8x8xf32>
    %71 = arith.mulf %70, %69 : vector<8x8xf32>
    %72 = arith.truncf %62 : vector<8x8xf32> to vector<8x8xbf16>
    %cst_56 = arith.constant dense<0.000000e+00> : vector<8x8xf32>
    %73 = tpu.matmul %72, %52, %cst_56 {dimension_numbers = #tpu.dot_dimension_numbers<[1], [0], [0], [1], [0, 0, 1, 1], [], []>} : vector<8x8xbf16>, vector<8x8xbf16>, vector<8x8xf32> -> vector<8x8xf32>
    %74 = arith.addf %71, %73 : vector<8x8xf32>
    %c0_57 = arith.constant 0 : index
    %c8_58 = arith.constant 8 : index
    %75 = vector.load %arg18[%c0_57, %c8_58] : memref<8x32xf32, #tpu.memory_space<vmem>>, vector<8x8xf32>
    tpu.vector_store %arg18[%c0_57, %c8_58], %74 {strides = array<i32>} : memref<8x32xf32, #tpu.memory_space<vmem>>, vector<8x8xf32>,
    %c0_59 = arith.constant 0 : index
    %c1_60 = arith.constant 1 : index
    %76 = vector.load %arg19[%c0_59, %c1_60] : memref<8x4xf32, #tpu.memory_space<vmem>>, vector<8x1xf32>
    tpu.vector_store %arg19[%c0_59, %c1_60], %57 {strides = array<i32>} : memref<8x4xf32, #tpu.memory_space<vmem>>, vector<8x1xf32>,
    %c0_61 = arith.constant 0 : index
    %c16 = arith.constant 16 : index
    %77 = vector.load %arg15[%c0_61, %c16] : memref<8x32xbf16, #tpu.memory_space<vmem>>, vector<8x8xbf16>
    %c0_62 = arith.constant 0 : index
    %c16_63 = arith.constant 16 : index
    %78 = vector.load %arg16[%c0_62, %c16_63] : memref<8x32xbf16, #tpu.memory_space<vmem>>, vector<8x8xbf16>
    %c0_64 = arith.constant 0 : index
    %c16_65 = arith.constant 16 : index
    %79 = vector.load %arg17[%c0_64, %c16_65] : memref<8x32xbf16, #tpu.memory_space<vmem>>, vector<8x8xbf16>
    %cst_66 = arith.constant dense<0.000000e+00> : vector<8x8xf32>
    %80 = tpu.matmul %77, %78, %cst_66 {dimension_numbers = #tpu.dot_dimension_numbers<[1], [1], [0], [0], [0, 0, 1, 0], [], []>} : vector<8x8xbf16>, vector<8x8xbf16>, vector<8x8xf32> -> vector<8x8xf32>
    %c0_67 = arith.constant 0 : index
    %c2 = arith.constant 2 : index
    %81 = vector.load %arg19[%c0_67, %c2] : memref<8x4xf32, #tpu.memory_space<vmem>>, vector<8x1xf32>
    %cst_68 = arith.constant dense<0xFF800000> : vector<8xf32>
    %82 = vector.multi_reduction <maximumf>, %80, %cst_68 [1] : vector<8x8xf32> to vector<8xf32>
    %83 = vector.shape_cast %82 : vector<8xf32> to vector<8x1xf32>
    %84 = arith.maximumf %81, %83 : vector<8x1xf32>
    %85 = arith.subf %81, %84 : vector<8x1xf32>
    %86 = math.exp %85 : vector<8x1xf32>
    %87 = vector.broadcast %84 : vector<8x1xf32> to vector<8x8xf32>
    %88 = arith.subf %80, %87 : vector<8x8xf32>
    %89 = math.exp %88 : vector<8x8xf32>
    %c0_69 = arith.constant 0 : index
    %c2_70 = arith.constant 2 : index
    %90 = vector.load %arg20[%c0_69, %c2_70] : memref<8x4xf32, #tpu.memory_space<vmem>>, vector<8x1xf32>
    %91 = arith.mulf %86, %90 : vector<8x1xf32>
    %cst_71 = arith.constant dense<0.000000e+00> : vector<8xf32>
    %92 = vector.multi_reduction <add>, %89, %cst_71 [1] : vector<8x8xf32> to vector<8xf32>
    %93 = vector.shape_cast %92 : vector<8xf32> to vector<8x1xf32>
    %94 = arith.addf %91, %93 : vector<8x1xf32>
    %c0_72 = arith.constant 0 : index
    %c2_73 = arith.constant 2 : index
    %95 = vector.load %arg20[%c0_72, %c2_73] : memref<8x4xf32, #tpu.memory_space<vmem>>, vector<8x1xf32>
    tpu.vector_store %arg20[%c0_72, %c2_73], %94 {strides = array<i32>} : memref<8x4xf32, #tpu.memory_space<vmem>>, vector<8x1xf32>,
    %c0_74 = arith.constant 0 : index
    %c16_75 = arith.constant 16 : index
    %96 = vector.load %arg18[%c0_74, %c16_75] : memref<8x32xf32, #tpu.memory_space<vmem>>, vector<8x8xf32>
    %97 = vector.broadcast %86 : vector<8x1xf32> to vector<8x8xf32>
    %98 = arith.mulf %97, %96 : vector<8x8xf32>
    %99 = arith.truncf %89 : vector<8x8xf32> to vector<8x8xbf16>
    %cst_76 = arith.constant dense<0.000000e+00> : vector<8x8xf32>
    %100 = tpu.matmul %99, %79, %cst_76 {dimension_numbers = #tpu.dot_dimension_numbers<[1], [0], [0], [1], [0, 0, 1, 1], [], []>} : vector<8x8xbf16>, vector<8x8xbf16>, vector<8x8xf32> -> vector<8x8xf32>
    %101 = arith.addf %98, %100 : vector<8x8xf32>
    %c0_77 = arith.constant 0 : index
    %c16_78 = arith.constant 16 : index
    %102 = vector.load %arg18[%c0_77, %c16_78] : memref<8x32xf32, #tpu.memory_space<vmem>>, vector<8x8xf32>
    tpu.vector_store %arg18[%c0_77, %c16_78], %101 {strides = array<i32>} : memref<8x32xf32, #tpu.memory_space<vmem>>, vector<8x8xf32>,
    %c0_79 = arith.constant 0 : index
    %c2_80 = arith.constant 2 : index
    %103 = vector.load %arg19[%c0_79, %c2_80] : memref<8x4xf32, #tpu.memory_space<vmem>>, vector<8x1xf32>
    tpu.vector_store %arg19[%c0_79, %c2_80], %84 {strides = array<i32>} : memref<8x4xf32, #tpu.memory_space<vmem>>, vector<8x1xf32>,
    %c0_81 = arith.constant 0 : index
    %c24 = arith.constant 24 : index
    %104 = vector.load %arg15[%c0_81, %c24] : memref<8x32xbf16, #tpu.memory_space<vmem>>, vector<8x8xbf16>
    %c0_82 = arith.constant 0 : index
    %c24_83 = arith.constant 24 : index
    %105 = vector.load %arg16[%c0_82, %c24_83] : memref<8x32xbf16, #tpu.memory_space<vmem>>, vector<8x8xbf16>
    %c0_84 = arith.constant 0 : index
    %c24_85 = arith.constant 24 : index
    %106 = vector.load %arg17[%c0_84, %c24_85] : memref<8x32xbf16, #tpu.memory_space<vmem>>, vector<8x8xbf16>
    %cst_86 = arith.constant dense<0.000000e+00> : vector<8x8xf32>
    %107 = tpu.matmul %104, %105, %cst_86 {dimension_numbers = #tpu.dot_dimension_numbers<[1], [1], [0], [0], [0, 0, 1, 0], [], []>} : vector<8x8xbf16>, vector<8x8xbf16>, vector<8x8xf32> -> vector<8x8xf32>
    %c0_87 = arith.constant 0 : index
    %c3 = arith.constant 3 : index
    %108 = vector.load %arg19[%c0_87, %c3] : memref<8x4xf32, #tpu.memory_space<vmem>>, vector<8x1xf32>
    %cst_88 = arith.constant dense<0xFF800000> : vector<8xf32>
    %109 = vector.multi_reduction <maximumf>, %107, %cst_88 [1] : vector<8x8xf32> to vector<8xf32>
    %110 = vector.shape_cast %109 : vector<8xf32> to vector<8x1xf32>
    %111 = arith.maximumf %108, %110 : vector<8x1xf32>
    %112 = arith.subf %108, %111 : vector<8x1xf32>
    %113 = math.exp %112 : vector<8x1xf32>
    %114 = vector.broadcast %111 : vector<8x1xf32> to vector<8x8xf32>
    %115 = arith.subf %107, %114 : vector<8x8xf32>
    %116 = math.exp %115 : vector<8x8xf32>
    %c0_89 = arith.constant 0 : index
    %c3_90 = arith.constant 3 : index
    %117 = vector.load %arg20[%c0_89, %c3_90] : memref<8x4xf32, #tpu.memory_space<vmem>>, vector<8x1xf32>
    %118 = arith.mulf %113, %117 : vector<8x1xf32>
    %cst_91 = arith.constant dense<0.000000e+00> : vector<8xf32>
    %119 = vector.multi_reduction <add>, %116, %cst_91 [1] : vector<8x8xf32> to vector<8xf32>
    %120 = vector.shape_cast %119 : vector<8xf32> to vector<8x1xf32>
    %121 = arith.addf %118, %120 : vector<8x1xf32>
    %c0_92 = arith.constant 0 : index
    %c3_93 = arith.constant 3 : index
    %122 = vector.load %arg20[%c0_92, %c3_93] : memref<8x4xf32, #tpu.memory_space<vmem>>, vector<8x1xf32>
    tpu.vector_store %arg20[%c0_92, %c3_93], %121 {strides = array<i32>} : memref<8x4xf32, #tpu.memory_space<vmem>>, vector<8x1xf32>,
    %c0_94 = arith.constant 0 : index
    %c24_95 = arith.constant 24 : index
    %123 = vector.load %arg18[%c0_94, %c24_95] : memref<8x32xf32, #tpu.memory_space<vmem>>, vector<8x8xf32>
    %124 = vector.broadcast %113 : vector<8x1xf32> to vector<8x8xf32>
    %125 = arith.mulf %124, %123 : vector<8x8xf32>
    %126 = arith.truncf %116 : vector<8x8xf32> to vector<8x8xbf16>
    %cst_96 = arith.constant dense<0.000000e+00> : vector<8x8xf32>
    %127 = tpu.matmul %126, %106, %cst_96 {dimension_numbers = #tpu.dot_dimension_numbers<[1], [0], [0], [1], [0, 0, 1, 1], [], []>} : vector<8x8xbf16>, vector<8x8xbf16>, vector<8x8xf32> -> vector<8x8xf32>
    %128 = arith.addf %125, %127 : vector<8x8xf32>
    %c0_97 = arith.constant 0 : index
    %c24_98 = arith.constant 24 : index
    %129 = vector.load %arg18[%c0_97, %c24_98] : memref<8x32xf32, #tpu.memory_space<vmem>>, vector<8x8xf32>
    tpu.vector_store %arg18[%c0_97, %c24_98], %128 {strides = array<i32>} : memref<8x32xf32, #tpu.memory_space<vmem>>, vector<8x8xf32>,
    %c0_99 = arith.constant 0 : index
    %c3_100 = arith.constant 3 : index
    %130 = vector.load %arg19[%c0_99, %c3_100] : memref<8x4xf32, #tpu.memory_space<vmem>>, vector<8x1xf32>
    tpu.vector_store %arg19[%c0_99, %c3_100], %111 {strides = array<i32>} : memref<8x4xf32, #tpu.memory_space<vmem>>, vector<8x1xf32>,
    %c0_i32_101 = arith.constant 0 : i32
    %131 = arith.cmpi eq, %arg2, %c0_i32_101 : i32
    %132 = arith.extui %131 : i1 to i32
    %c0_i32_102 = arith.constant 0 : i32
    %133 = arith.cmpi ne, %132, %c0_i32_102 : i32
    scf.if %133 {
      %c0_103 = arith.constant 0 : index
      %c0_104 = arith.constant 0 : index
      %134 = vector.load %arg20[%c0_103, %c0_104] : memref<8x4xf32, #tpu.memory_space<vmem>>, vector<8x1xf32>
      %135 = tpu.reciprocal %134 {approx = true} : vector<8x1xf32> -> vector<8x1xf32>
      %c0_105 = arith.constant 0 : index
      %c0_106 = arith.constant 0 : index
      %136 = vector.load %arg18[%c0_105, %c0_106] : memref<8x32xf32, #tpu.memory_space<vmem>>, vector<8x8xf32>
      %137 = vector.broadcast %135 : vector<8x1xf32> to vector<8x8xf32>
      %138 = arith.mulf %136, %137 : vector<8x8xf32>
      %c0_107 = arith.constant 0 : index
      %c0_108 = arith.constant 0 : index
      %139 = vector.load %arg18[%c0_107, %c0_108] : memref<8x32xf32, #tpu.memory_space<vmem>>, vector<8x8xf32>
      tpu.vector_store %arg18[%c0_107, %c0_108], %138 {strides = array<i32>} : memref<8x32xf32, #tpu.memory_space<vmem>>, vector<8x8xf32>,
      %c0_109 = arith.constant 0 : index
      %c1_110 = arith.constant 1 : index
      %140 = vector.load %arg20[%c0_109, %c1_110] : memref<8x4xf32, #tpu.memory_space<vmem>>, vector<8x1xf32>
      %141 = tpu.reciprocal %140 {approx = true} : vector<8x1xf32> -> vector<8x1xf32>
      %c0_111 = arith.constant 0 : index
      %c8_112 = arith.constant 8 : index
      %142 = vector.load %arg18[%c0_111, %c8_112] : memref<8x32xf32, #tpu.memory_space<vmem>>, vector<8x8xf32>
      %143 = vector.broadcast %141 : vector<8x1xf32> to vector<8x8xf32>
      %144 = arith.mulf %142, %143 : vector<8x8xf32>
      %c0_113 = arith.constant 0 : index
      %c8_114 = arith.constant 8 : index
      %145 = vector.load %arg18[%c0_113, %c8_114] : memref<8x32xf32, #tpu.memory_space<vmem>>, vector<8x8xf32>
      tpu.vector_store %arg18[%c0_113, %c8_114], %144 {strides = array<i32>} : memref<8x32xf32, #tpu.memory_space<vmem>>, vector<8x8xf32>,
      %c0_115 = arith.constant 0 : index
      %c2_116 = arith.constant 2 : index
      %146 = vector.load %arg20[%c0_115, %c2_116] : memref<8x4xf32, #tpu.memory_space<vmem>>, vector<8x1xf32>
      %147 = tpu.reciprocal %146 {approx = true} : vector<8x1xf32> -> vector<8x1xf32>
      %c0_117 = arith.constant 0 : index
      %c16_118 = arith.constant 16 : index
      %148 = vector.load %arg18[%c0_117, %c16_118] : memref<8x32xf32, #tpu.memory_space<vmem>>, vector<8x8xf32>
      %149 = vector.broadcast %147 : vector<8x1xf32> to vector<8x8xf32>
      %150 = arith.mulf %148, %149 : vector<8x8xf32>
      %c0_119 = arith.constant 0 : index
      %c16_120 = arith.constant 16 : index
      %151 = vector.load %arg18[%c0_119, %c16_120] : memref<8x32xf32, #tpu.memory_space<vmem>>, vector<8x8xf32>
      tpu.vector_store %arg18[%c0_119, %c16_120], %150 {strides = array<i32>} : memref<8x32xf32, #tpu.memory_space<vmem>>, vector<8x8xf32>,
      %c0_121 = arith.constant 0 : index
      %c3_122 = arith.constant 3 : index
      %152 = vector.load %arg20[%c0_121, %c3_122] : memref<8x4xf32, #tpu.memory_space<vmem>>, vector<8x1xf32>
      %153 = tpu.reciprocal %152 {approx = true} : vector<8x1xf32> -> vector<8x1xf32>
      %c0_123 = arith.constant 0 : index
      %c24_124 = arith.constant 24 : index
      %154 = vector.load %arg18[%c0_123, %c24_124] : memref<8x32xf32, #tpu.memory_space<vmem>>, vector<8x8xf32>
      %155 = vector.broadcast %153 : vector<8x1xf32> to vector<8x8xf32>
      %156 = arith.mulf %154, %155 : vector<8x8xf32>
      %c0_125 = arith.constant 0 : index
      %c24_126 = arith.constant 24 : index
      %157 = vector.load %arg18[%c0_125, %c24_126] : memref<8x32xf32, #tpu.memory_space<vmem>>, vector<8x8xf32>
      tpu.vector_store %arg18[%c0_125, %c24_126], %156 {strides = array<i32>} : memref<8x32xf32, #tpu.memory_space<vmem>>, vector<8x8xf32>,
      %c0_127 = arith.constant 0 : index
      %c0_128 = arith.constant 0 : index
      %158 = vector.load %arg18[%c0_127, %c0_128] : memref<8x32xf32, #tpu.memory_space<vmem>>, vector<8x32xf32>
      %159 = arith.truncf %158 : vector<8x32xf32> to vector<8x32xbf16>
      %c0_129 = arith.constant 0 : index
      %c0_130 = arith.constant 0 : index
      %160 = vector.load %arg12[%c0_129, %c0_130] : memref<32x32xbf16, #tpu.memory_space<vmem>>, vector<32x32xbf16>
      %cst_131 = arith.constant dense<0.000000e+00> : vector<8x32xf32>
      %161 = tpu.matmul %159, %160, %cst_131 {dimension_numbers = #tpu.dot_dimension_numbers<[1], [0], [0], [1], [0, 0, 1, 1], [], []>} : vector<8x32xbf16>, vector<32x32xbf16>, vector<8x32xf32> -> vector<8x32xf32>
      %c0_132 = arith.constant 0 : index
      %c0_133 = arith.constant 0 : index
      %162 = vector.load %arg13[%c0_132, %c0_133] : memref<1x32xf32, #tpu.memory_space<vmem>>, vector<1x32xf32>
      %163 = vector.broadcast %162 : vector<1x32xf32> to vector<8x32xf32>
      %164 = arith.addf %161, %163 : vector<8x32xf32>
      %c0_134 = arith.constant 0 : index
      %c0_135 = arith.constant 0 : index
      %c0_136 = arith.constant 0 : index
      %165 = vector.load %arg14[%c0_134, %c0_135, %c0_136] : memref<1x8x32xf32, #tpu.memory_space<vmem>>, vector<1x8x32xf32>
      %166 = vector.shape_cast %165 : vector<1x8x32xf32> to vector<8x32xf32>
      %167 = vector.shape_cast %164 : vector<8x32xf32> to vector<1x8x32xf32>
      tpu.vector_store %arg14[%c0_134, %c0_135, %c0_136], %167 {strides = array<i32>} : memref<1x8x32xf32, #tpu.memory_space<vmem>>, vector<1x8x32xf32>,
    } else {
    }
    return
  }
  func.func @transform_0(%arg0: i32, %arg1: i32, %arg2: i32) -> (i32, i32, i32) {
    %c0_i32 = arith.constant 0 : i32
    %c0_i32_0 = arith.constant 0 : i32
    return %arg0, %arg1, %c0_i32 : i32, i32, i32
  }
  func.func @transform_1(%arg0: i32, %arg1: i32, %arg2: i32) -> (i32, i32, i32) {
    %c0_i32 = arith.constant 0 : i32
    %c0_i32_0 = arith.constant 0 : i32
    return %arg0, %arg2, %c0_i32 : i32, i32, i32
  }
  func.func @transform_2(%arg0: i32, %arg1: i32, %arg2: i32) -> (i32, i32, i32) {
    %c0_i32 = arith.constant 0 : i32
    %c0_i32_0 = arith.constant 0 : i32
    return %arg0, %arg2, %c0_i32 : i32, i32, i32
  }
  func.func @transform_3(%arg0: i32, %arg1: i32, %arg2: i32) -> (i32, i32) {
    %c0_i32 = arith.constant 0 : i32
    %c0_i32_0 = arith.constant 0 : i32
    %c0_i32_1 = arith.constant 0 : i32
    return %c0_i32, %c0_i32_0 : i32, i32
  }
  func.func @transform_4(%arg0: i32, %arg1: i32, %arg2: i32) -> (i32, i32) {
    %c0_i32 = arith.constant 0 : i32
    %c0_i32_0 = arith.constant 0 : i32
    %c0_i32_1 = arith.constant 0 : i32
    return %c0_i32, %c0_i32_0 : i32, i32
  }
  func.func @transform_5(%arg0: i32, %arg1: i32, %arg2: i32) -> (i32, i32) {
    %c0_i32 = arith.constant 0 : i32
    %c0_i32_0 = arith.constant 0 : i32
    %c0_i32_1 = arith.constant 0 : i32
    return %c0_i32, %c0_i32_0 : i32, i32
  }
  func.func @transform_6(%arg0: i32, %arg1: i32, %arg2: i32) -> (i32, i32) {
    %c0_i32 = arith.constant 0 : i32
    %c0_i32_0 = arith.constant 0 : i32
    %c0_i32_1 = arith.constant 0 : i32
    return %c0_i32, %c0_i32_0 : i32, i32
  }
  func.func @transform_7(%arg0: i32, %arg1: i32, %arg2: i32) -> (i32, i32) {
    %c0_i32 = arith.constant 0 : i32
    %c0_i32_0 = arith.constant 0 : i32
    %c0_i32_1 = arith.constant 0 : i32
    return %c0_i32, %c0_i32_0 : i32, i32
  }
  func.func @transform_8(%arg0: i32, %arg1: i32, %arg2: i32) -> (i32, i32) {
    %c0_i32 = arith.constant 0 : i32
    %c0_i32_0 = arith.constant 0 : i32
    %c0_i32_1 = arith.constant 0 : i32
    return %c0_i32, %c0_i32_0 : i32, i32
  }
  func.func @transform_9(%arg0: i32, %arg1: i32, %arg2: i32) -> (i32, i32) {
    %c0_i32 = arith.constant 0 : i32
    %c0_i32_0 = arith.constant 0 : i32
    %c0_i32_1 = arith.constant 0 : i32
    return %c0_i32, %c0_i32_0 : i32, i32
  }
  func.func @transform_10(%arg0: i32, %arg1: i32, %arg2: i32) -> (i32, i32) {
    %c0_i32 = arith.constant 0 : i32
    %c0_i32_0 = arith.constant 0 : i32
    %c0_i32_1 = arith.constant 0 : i32
    return %c0_i32, %c0_i32_0 : i32, i32
  }
  func.func @transform_11(%arg0: i32, %arg1: i32, %arg2: i32) -> (i32, i32, i32) {
    %c0_i32 = arith.constant 0 : i32
    %c0_i32_0 = arith.constant 0 : i32
    return %arg0, %arg1, %c0_i32 : i32, i32, i32
  }
}

</mosaic_0001>

<bundles_post_ra>
// kernel: tpu_custom_call.1
= control target key start
LH: loop header
LB: loop body
LE: loop exit
PB: predicated region body
PF: predicated region fallthrough
CT: control target
= control target key end

     0   :  { %s2334_s0 = inlined_call_operand.hbm [shape: f32[2,8,32], index: 0, kind: input, shape index: {}]   ;;  %s2335_s1 = inlined_call_operand.hbm [shape: f32[2,8,32], index: 1, kind: input, shape index: {}]   ;;  %s2336_s2 = inlined_call_operand.hbm [shape: f32[2,8,32], index: 2, kind: input, shape index: {}]   ;;  %s2337_s3 = inlined_call_operand.hbm [shape: bf16[32,32], index: 3, kind: input, shape index: {}]   ;;  %s2338_s4 = inlined_call_operand.vmem [shape: f32[1,32], index: 4, kind: input, shape index: {}]   ;;  %s2339_s5 = inlined_call_operand.hbm [shape: bf16[32,32], index: 5, kind: input, shape index: {}]   ;;  %s2340_s6 = inlined_call_operand.vmem [shape: f32[1,32], index: 6, kind: input, shape index: {}]   ;;  %s2341_s7 = inlined_call_operand.hbm [shape: bf16[32,32], index: 7, kind: input, shape index: {}]   ;;  %s2342_s8 = inlined_call_operand.vmem [shape: f32[1,32], index: 8, kind: input, shape index: {}]   ;;  %s2343_s9 = inlined_call_operand.hbm [shape: bf16[32,32], index: 9, kind: input, shape index: {}]   ;;  %s2344_s10 = inlined_call_operand.vmem [shape: f32[1,32], index: 10, kind: input, shape index: {}]   ;;  %s2345_s11 = inlined_call_operand.hbm [shape: f32[2,8,32], index: 11, kind: output, shape index: {}]  }
   0x1   :  { %2359 = sst [smem:[#allocation33_spill]] %s2334_s0 }
   0x2   :  { %2360 = sst [smem:[#allocation34_spill]] %s2335_s1 }
   0x3   :  { %2361 = sst [smem:[#allocation35_spill]] %s2337_s3 }
   0x4   :  { %2362 = sst [smem:[#allocation36_spill]] %s2339_s5 }
   0x5   :  { %2363 = sst [smem:[#allocation37_spill]] %s2341_s7 }
   0x6   :  { %2364 = sst [smem:[#allocation38_spill]] %s2343_s9 }
   0x7   :  { %2365 = sst [smem:[#allocation39_spill]] %s2344_s10 }
   0x8   :  { %16 = vsyncpa [#allocation9], 0 }
   0x9   :  { %18 = vsyncpa [#allocation9 + $0x1], 0 }
   0xa   :  { %19 = vsyncpa [#allocation12], 0 }
   0xb   :  { %21 = vsyncpa [#allocation12 + $0x1], 0 }
   0xc   :  { %22 = vsyncpa [#allocation15], 0 }
   0xd   :  { %23 = vsyncpa [#allocation18], 0 }
   0xe   :  { %24 = vsyncpa [#allocation10], 0 }
   0xf   :  { %26 = vsyncpa [#allocation10 + $0x1], 0  ;;  %s1964_s17 = smov 0   ;;  %s1966_s18 = smov 0  }
  0x10   :  { %s1968_s19 = smov 0   ;;  %s1970_s20 = smov 0  }
  0x11   :  { %s1972_s21 = smov 0   ;;  %s1974_s22 = smov 0  }
  0x12 LB: > { %2366 = sst [smem:[#allocation26_spill]] %s1864_s17  ;;  %s1995_s23 = sadd.s32 4294967295, %s1884_s22   ;;  %s1884_s22 = sphi %s1974_s22, %s32_s22   ;;  %s1880_s21 = sphi %s1972_s21, %s2400_s21   ;;  %s1876_s20 = sphi %s1970_s20, %s2395_s20   ;;  %s1872_s19 = sphi %s1968_s19, %s2399_s19   ;;  %s1868_s18 = sphi %s1966_s18, %s2398_s18   ;;  %s1864_s17 = sphi %s1964_s17, %s2397_s17  }
  0x13   : > { %2367 = sst [smem:[#allocation27_spill]] %s1880_s21  ;;  %p1342_p0 = scmp.ge.s32.totalorder %s1884_s22, 1 }
  0x14   : > { %2368 = sst [smem:[#allocation28_spill]] %s1884_s22  ;;  %p74_p1 = scmp.eq.s32.totalorder %s1995_s23, 0 }
  0x15   : > { %p336_p2 = scmp.lt.s32.totalorder %s1884_s22, 3  ;;  %s2369_s3 = sld [smem:[#allocation35_spill]] }
  0x16   : > { %s1886_s28 = smov [#allocation14]   ;;  %p1347_p6 = scmp.ge.s32.totalorder %s1884_s22, 2 }
  0x17   : > { %p2003_p3 = pnand %p1342_p0, %p336_p2  ;;  %s349_s29 = sshll.u32 %s1886_s28, 4  ;;  %s350_s29 = int_to_ptr.vmem [resolvable:$true] %s349_s29 }
  0x18   : > { %s2372_s7 = sld [smem:[#allocation37_spill]]  ;;  %s2346_s15 = smov 64  }
  0x19   : > { %p1443_p4 = pneg %p2003_p3  ;;  %s2348_s16 = smov 4  }
  0x1a   : > { %s1889_s24 = smov [#allocation17]   ;;  %s1341_s28 = sadd.s32 4294967294, %s1884_s22  }
  0x1b   : > { %s347_s26 = sshll.u32 %s2369_s3, 4  ;;  %p2011_p5 = pnand %p1443_p4, %p74_p1  ;;  %s348_s26 = int_to_ptr.hbm [resolvable:$true] %s347_s26 }
  0x1c   : > { %s383_s25 = sshll.u32 %s1889_s24, 4  ;;  %s51_s12 = sadd.s32 1, %s1880_s21  ;;  %s384_s25 = int_to_ptr.vmem [resolvable:$true] %s383_s25 }
  0x1d   : > { %1446 = dma.hbm_to_vmem [thread:$0]  (!%p2011_p5), %s348_s26, 256, %s350_s29, [#allocation15], %s2346_s15, %s2346_s15, %s2348_s16  }
  0x1e   : > { %s381_s14 = sshll.u32 %s2372_s7, 4  ;;  %p53_p7 = scmp.ge.s32.totalorder %s51_s12, 2  ;;  %s382_s14 = int_to_ptr.hbm [resolvable:$true] %s381_s14 }
  0x1f   : > { %1452 = dma.hbm_to_vmem [thread:$0]  (!%p2011_p5), %s382_s14, 256, %s384_s25, [#allocation18], %s2346_s15, %s2346_s15, %s2348_s16  }
  0x20   : > { %s60_s13 = sadd.s32 1, %s1872_s19  ;;  %p67_p8 = scmp.ne.s32.totalorder %s1872_s19, %s1868_s18 }
  0x21   : > { %p68_p9 = scmp.eq.s32.totalorder %s1884_s22, 0  ;;  %s2402_s12 = smov (%p53_p7, %s51_s12), 0 }
  0x22   : > { %2373 = sst [smem:[#allocation29_spill]] %s2402_s12  ;;  %p73_p11 = scmp.ne.s32.totalorder %s1868_s18, %s1864_s17 }
  0x23   : > { %p2037_p10 = por %p68_p9, %p67_p8  ;;  %s55_s29 = ssub.s32 %s1880_s21, %s2402_s12 }
  0x24   : > { %p323_p12 = scmp.eq.s32.totalorder %s1995_s23, 1  ;;  %p58_p13 = scmp.eq.s32.totalorder %s55_s29, 0 }
  0x25   : > { %p2048_p0 = por %p74_p1, %p73_p11  ;;  %p329_p4 = scmp.eq.s32.totalorder %s1341_s28, 1 }
  0x26   : > { %p2052_p2 = por %p323_p12, %p67_p8  ;;  %p1474_p9 = scmp.lt.s32.totalorder %s1884_s22, 2 }
  0x27   : > { %s2057_s25 = scalar_select %p58_p13, %s1872_s19, %s60_s13  }
  0x28   : > { %s2376_s24 = scalar_select %p2052_p2, 1, 0 }
  0x29   : > { %2378 = sst [smem:[#allocation31_spill]] %s2057_s25  ;;  %p2059_p7 = por %p329_p4, %p73_p11 }
  0x2a   : > { %2377 = sst [smem:[#allocation30_spill]] %s2376_s24  ;;  %s2354_s16 = sand.u32 1, %s1872_s19  }
  0x2b   : > { %s2379_s15 = scalar_select %p2059_p7, 1, 0 }
  0x2c   : > { %s2066_s3 = sshll.u32 %s1880_s21, 3  ;;  %s2070_s29 = sshll.u32 %s2354_s16, 3 }
  0x2d   : > { %2380 = sst [smem:[#allocation32_spill]] %s2379_s15  ;;  %p2074_p8 = pnand %p1474_p9, %p2037_p10 }
  0x2e   : > { %s437_s28 = sand.u32 1, %s1884_s22   ;;  %s2382_s1 = sld [smem:[#allocation34_spill]] }
  0x2f   : > { %s441_s15 = scalar_lea.vmem [#allocation11], %s2070_s29  ;;  %s2383_s5 = sld [smem:[#allocation36_spill]] }
  0x30   : > { %s450_s21 = sshll.u32 %s441_s15, 4  ;;  %s438_s24 = scalar_lea.sflag [#allocation12], %s437_s28  ;;  %s451_s21 = int_to_ptr.vmem [resolvable:$true] %s450_s21 }
  0x31   : > { %s1890_s22 = smov [#allocation16]   ;;  %s2384_s9 = sld [smem:[#allocation38_spill]] }
  0x32   : > { %s366_s12 = sshll.u32 %s1890_s22, 4  ;;  %s2386_s16 = smov 64   ;;  %s367_s12 = int_to_ptr.vmem [resolvable:$true] %s366_s12 }
  0x33   : > { %s1891_s28 = smov [#allocation19]   ;;  %s2387_s0 = sld [smem:[#allocation33_spill]] }
  0x34   : > { %s446_s25 = scalar_lea.hbm %s2382_s1, %s2066_s3  ;;  %s421_s13 = scalar_lea.vmem [#allocation8], %s2070_s29 }
  0x35   : > { %s448_s17 = sshll.u32 %s446_s25, 4  ;;  %s364_s10 = sshll.u32 %s2383_s5, 4  ;;  %s449_s17 = int_to_ptr.hbm [resolvable:$true] %s448_s17  ;;  %s365_s10 = int_to_ptr.hbm [resolvable:$true] %s364_s10 }
  0x36   : > { %1462 = dma.hbm_to_vmem [thread:$0]  (!%p2074_p8), %s449_s17, 128, %s451_s21, %s438_s24  }
  0x37   : > { %s398_s15 = sshll.u32 %s2384_s9, 4  ;;  %s2385_s25 = smov 4   ;;  %s399_s15 = int_to_ptr.hbm [resolvable:$true] %s398_s15 }
  0x38   : > { %1449 = dma.hbm_to_vmem [thread:$0]  (!%p2011_p5), %s365_s10, 256, %s367_s12, [#allocation15], %s2386_s16, %s2386_s16, %s2385_s25  }
  0x39   : > { %s400_s17 = sshll.u32 %s1891_s28, 4  ;;  %s426_s22 = scalar_lea.hbm %s2387_s0, %s2066_s3  ;;  %s401_s17 = int_to_ptr.vmem [resolvable:$true] %s400_s17 }
  0x3a   : > { %1455 = dma.hbm_to_vmem [thread:$0]  (!%p2011_p5), %s399_s15, 256, %s401_s17, [#allocation18], %s2386_s16, %s2386_s16, %s2385_s25  }
  0x3b   : > { %s428_s1 = sshll.u32 %s426_s22, 4  ;;  %s430_s5 = sshll.u32 %s421_s13, 4  ;;  %s429_s1 = int_to_ptr.hbm [resolvable:$true] %s428_s1  ;;  %s431_s5 = int_to_ptr.vmem [resolvable:$true] %s430_s5 }
  0x3c   : > { %s2388_s9 = sand.u32 1, %s1872_s19   ;;  %s466_s21 = scalar_lea.hbm %s2336_s2, %s2066_s3 }
  0x3d   : > { %s418_s10 = scalar_lea.sflag [#allocation9], %s2388_s9  ;;  %s468_s26 = sshll.u32 %s466_s21, 4  ;;  %s469_s26 = int_to_ptr.hbm [resolvable:$true] %s468_s26 }
  0x3e   : > { %1459 = dma.hbm_to_vmem [thread:$0]  (!%p2074_p8), %s429_s1, 128, %s431_s5, %s418_s10  }
  0x3f   : > { %s461_s0 = scalar_lea.vmem [#allocation13], %s2070_s29  ;;  %479 = sbr.rel (%p2003_p3) target bundleno = 1188 (0x4a4), region = 64 }
  0x40   : > { %s470_s30 = sshll.u32 %s461_s0, 4  ;;  %s2121_s15 = sand.u32 (!%p2003_p3), 1, %s1868_s18   ;;  %s471_s30 = int_to_ptr.vmem [resolvable:$true] %s470_s30 }
  0x41   : > { %1465 = dma.hbm_to_vmem [thread:$0]  (!%p2074_p8), %s469_s26, 128, %s471_s30, %s438_s24  }
  0x42   : > { %s2124_s5 = sshll.u32 (!%p2003_p3), %s2121_s15, 3  ;;  %s482_s3 = scalar_lea.sflag (!%p2003_p3), [#allocation9], %s2121_s15 }
  0x43   : > { %s485_s9 = scalar_lea.vmem (!%p2003_p3), [#allocation8], %s2124_s5 }
  0x44   : > { %1843 = dma.done.wait (%p2048_p0), %s482_s3, 128  }
  0x45   : > { %1845 = vsyncadd (%p2048_p0), %s482_s3, 4294967168  ;;  %s491_s0 = sand.u32 1, %s1995_s23   ;;  %s495_s27 = scalar_lea.vmem [#allocation11], %s2124_s5 }
  0x46   : > { %s492_s7 = scalar_lea.sflag [#allocation12], %s491_s0 }
  0x47   : > { %1847 = dma.done.wait (%p2048_p0), %s492_s7, 256  }
  0x48   : > { %1849 = vsyncadd (%p2048_p0), %s492_s7, 4294967040  ;;  %s505_s24 = scalar_lea.vmem [#allocation13], %s2124_s5 }
  0x49   : > { %1851 = dma.done.wait (%p74_p1), [#allocation15], 512  }
  0x4a   : > { %1853 = vsyncadd (%p74_p1), [#allocation15], 4294966784 }
  0x4b   : > { %1855 = dma.done.wait (%p74_p1), [#allocation18], 512  }
  0x4c   : > { %1857 = vsyncadd (%p74_p1), [#allocation18], 4294966784  ;;  %v1414_v0 = vld [vmem:[#allocation16 + $0x8] sm:$0xff]  ;;  %v1412_v1 = vld [vmem:[#allocation14 + $0x8] sm:$0xff]  ;;  %vm602_vm0 = vcmask 261120   ;;  %vm621_vm1 = vcmask 257024  }
  0x4d   : > { %v1413_v2 = vld [vmem:[#allocation16] sm:$0xff]  ;;  %v1411_v3 = vld [vmem:[#allocation14] sm:$0xff]  ;;  %659 = vmatpush.bf16.msra.mxu1 %v1414_v0  ;;  %612 = vmatpush.bf16.msra.mxu0 %v1412_v1  ;;  %v1558_v8 = vld [vmem:[%s2340_s6] ss:$0 sm:$0xff]  ;;  %vm712_vm2 = vcmask 64512   ;;  %s1892_s16 = smov 104  }
  0x4e   : > { %v627_v4 = vld [vmem:[%s495_s27] sm:$0xff]  ;;  %v580_v5 = vld [vmem:[%s485_s9] sm:$0xff]  ;;  %s1893_s17 = smov 112   ;;  %s1894_s22 = smov 120   ;;  %vm623_vm3 = vcmask 31744   ;;  %v1895_v56 = vmov -inf  }
  0x4f   : > { %v628_v6 = vpack.c.bf16 %v627_v4, %v627_v4  ;;  %v581_v7 = vpack.c.bf16 %v580_v5, %v580_v5  ;;  %v1559_v9 = vld [vmem:[%s2338_s4] ss:$0 sm:$0xff]  ;;  %v1415_v41 = vld [vmem:[#allocation17] sm:$0xff]  ;;  %v669_v42 = vld [vmem:[%s505_s24] sm:$0xff]  ;;  %624 = vst.msk [vmem:[#allocation6] sm:$0xff] %vm623_vm3, %v1895_v56  ;;  %v1896_v57 = vmov 0.0  }
  0x50   : > { %v1416_v40 = vld [vmem:[#allocation17 + $0x8] sm:$0xff]  ;;  %v670_v48 = vpack.c.bf16 %v669_v42, %v669_v42  ;;  %625 = vst.msk [vmem:[#allocation7] sm:$0xff] %vm623_vm3, %v1896_v57  ;;  %v1897_v58 = vmov 0   ;;  %vm754_vm4 = vcmask 7168   ;;  %vm767_vm5 = vcmask 1043456   ;;  %s1901_s10 = smov 8  }
  0x51   : > { %660 = vmatpush.bf16.msra.mxu1 %v1413_v2  ;;  %613 = vmatpush.bf16.msra.mxu0 %v1411_v3  ;;  %626 = vst.msk [vmem:[#allocation5] sm:$0xff] %vm602_vm0, %v1896_v57  ;;  %v1560_v59 = vld [vmem:[%s2342_s8] ss:$0 sm:$0xff]  ;;  %vm841_vm6 = vcmask 15368   ;;  %vm937_vm7 = vcmask 23568   ;;  %vm1033_vm8 = vcmask 31768  }
  0x52   : > { %700 = vmatpush.bf16.msra.mxu2 %v1416_v40  ;;  %1547 = vset.pattern.permute.xlu1 %v1897_v58  ;;  %s1902_s12 = smov 16   ;;  %s1903_s28 = smov 24   ;;  %vm880_vm9 = vcmask 130112   ;;  %vm976_vm10 = vcmask 195712   ;;  %vm1072_vm11 = vcmask 261312  }
  0x53   : > { %s1408_s21 = sshll.u32 %s1876_s20, 3  ;;  %s2390_s27 = sld [smem:[#allocation39_spill]] }
  0x54   : > { %1380 = vmatmul.msk.bf16.vlgmr.msra.gmra.mxu1 %vm602_vm0, %v628_v6  ;;  %1371 = vmatmul.msk.bf16.vlgmr.msra.gmra.mxu0 %vm602_vm0, %v581_v7  ;;  %s1169_s9 = scalar_lea.hbm %s2345_s11, %s1408_s21  ;;  %s574_s24 = scalar_lea.vmem [#allocation20], %s2124_s5 }
  0x55   : > { %s1171_s14 = sshll.u32 %s574_s24, 4  ;;  %s1173_s23 = sshll.u32 %s1169_s9, 4  ;;  %s1172_s14 = int_to_ptr.vmem [resolvable:$true] %s1171_s14  ;;  %s1174_s23 = int_to_ptr.hbm [resolvable:$true] %s1173_s23 }
  0x56   : > { %701 = vmatpush.bf16.msra.mxu2 %v1415_v41  ;;  %v2187_v62 = vld [vmem:[#allocation6] sm:$0xff]  ;;  %s1158_s29 = scalar_lea.sflag [#allocation10], %s2121_s15  ;;  %s1804_s20 = sshra.s32 %s1174_s23, 4  ;;  %s1805_s20 = int_to_ptr.hbm [resolvable:$true] %s1804_s20 }
  0x57   : > { %s1806_s25 = scalar_lea.hbm %s1805_s20, 8  ;;  %s1810_s5 = scalar_lea.hbm %s2345_s11, 16 }
  0x58   : > { %p1807_p1 = scmp.ne.s32.totalorder %s1805_s20, %s1806_s25  ;;  %p1811_p10 = scmp.lt.s32.totalorder %s1805_s20, %s2345_s11 }
  0x59   : > { %1389 = vmatmul.msk.bf16.vlgmr.msra.gmra.mxu2 %vm602_vm0, %v670_v48  ;;  %p1812_p11 = scmp.lt.s32.totalorder %s1810_s5, %s1806_s25 }
  0x5a   : > { %p1808_p3 = pnand %p1807_p1, %p2052_p2 }
  0x5b   : > { %p1813_p12 = por %p1812_p11, %p1811_p10 }
  0x5c   : > { %p1809_p5 = pneg %p1808_p3 }
  0x5e   : > { %p1814_p13 = pnand %p1813_p12, %p1809_p5 }
  0xd1   : > { %v662_v10 = vpop.f32.mrf.mxu1  ;;  %v615_v11 = vpop.f32.mrf.mxu0 }
  0xd2   : > { %v663_v12 = vadd.f32 %v1558_v8, %v662_v10  ;;  %v616_v13 = vadd.f32 %v1559_v9, %v615_v11 }
  0xd4   : > { %v666_v14 = vpack.c.bf16 %v663_v12, %v663_v12  ;;  %v619_v15 = vmul.f32 0.35355338, %v616_v13  ;;  %v1898_v13 = vmov 1  }
  0xd5   : > { %1546 = vset.pattern.permute.xlu0 %v1898_v13 }
  0xd6   : > { %668 = vst.msk [vmem:[#allocation3] sm:$0xf] %vm621_vm1, %v666_v14  ;;  %v620_v16 = vpack.c.bf16 %v619_v15, %v619_v15 }
  0xd8   : > { %622 = vst.msk [vmem:[#allocation2] sm:$0xf] %vm621_vm1, %v620_v16  ;;  %v1899_v16 = vmov 2  }
  0xd9   : > { %v664_v17 = vpop.f32.mrf.mxu1  ;;  %v617_v18 = vpop.f32.mrf.mxu0 }
  0xda   : > { %v1900_v18 = vmov 3  }
  0xdb   : > { %1549 = vset.pattern.permute.xlu2 %v1900_v18 }
  0xdc   : > { %v703_v63 = vpop.f32.mrf.mxu2 }
  0xdd   : > { %v710_v19 = vld [vmem:[#allocation3] sm:$0xf]  ;;  %v704_v1 = vadd.f32 %v1560_v59, %v703_v63 }
  0xde   : > { %v980_v20 = vld [vmem:[#allocation3] sm:$0xf]  ;;  %v717_v22 = vsel %vm712_vm2, %v710_v19, 0 }
  0xdf   : > { %v884_v21 = vld [vmem:[#allocation3] sm:$0xf]  ;;  %v988_v23 = vunpack.c.l.b16 %v980_v20  ;;  %726 = vmatpush.bf16.xpose.msra.mxu3 %v717_v22  ;;  %v883_v27 = vld [vmem:[#allocation2] sm:$0xf]  ;;  %v707_v4 = vpack.c.bf16 %v704_v1, %v704_v1 }
  0xe0   : > { %v892_v24 = vunpack.c.l.b16 %v884_v21  ;;  %v788_v25 = vld [vmem:[#allocation3] sm:$0xf]  ;;  %v787_v30 = vld [vmem:[#allocation2] sm:$0xf]  ;;  %v887_v33 = vunpack.c.l.b16 %v883_v27 }
  0xe1   : > { %v796_v26 = vunpack.c.l.b16 %v788_v25  ;;  %v989_v28 = vpack.c.b16 %v988_v23, %v988_v23  ;;  %v979_v31 = vld [vmem:[#allocation2] sm:$0xf]  ;;  %v791_v36 = vunpack.c.l.b16 %v787_v30  ;;  %708 = vst.msk [vmem:[#allocation4] sm:$0xf] %vm621_vm1, %v707_v4 }
  0xe2   : > { %v893_v29 = vpack.c.b16 %v892_v24, %v892_v24  ;;  %v983_v34 = vunpack.c.l.b16 %v979_v31  ;;  %v709_v35 = vld [vmem:[#allocation2] sm:$0xf]  ;;  %v888_v37 = vpack.c.b16 %v887_v33, %v887_v33 }
  0xe3   : > { %v797_v32 = vpack.c.b16 %v796_v26, %v796_v26  ;;  %990 = vrot.lane.b32.xlu2 %v989_v28, %s1892_s16  ;;  %v792_v39 = vpack.c.b16 %v791_v36, %v791_v36 }
  0xe4   : > { %894 = vrot.lane.b32.xlu1 %v893_v29, %s1893_s17  ;;  %v984_v38 = vpack.c.b16 %v983_v34, %v983_v34  ;;  %v705_v8 = vpop.f32.mrf.mxu2 }
  0xe5   : > { %798 = vrot.lane.b32.xlu0 %v797_v32, %s1894_s22 }
  0xe6   : > { %1390 = vmatmul.msk.bf16.vlgmr.msra.gmra.mxu3 %vm712_vm2, %v709_v35 }
  0xe8   : > { %v789_v14 = vld [vmem:[#allocation4] sm:$0xf] }
  0xe9   : > { %v852_v15 = vunpack.c.l.b16 %v789_v14  ;;  %v711_v19 = vld [vmem:[#allocation4] sm:$0xf] }
  0xea   : > { %v769_v20 = vsel %vm767_vm5, %v711_v19, 0  ;;  %v885_v27 = vld [vmem:[#allocation4] sm:$0xf] }
  0xeb   : > { %985 = vrot.lane.b32.xlu2 %v984_v38, %s1892_s16  ;;  %v853_v17 = vpack.c.b16 %v852_v15, %v852_v15  ;;  %778 = vmatpush.bf16.msrb.mxu0 %v769_v20  ;;  %v948_v30 = vunpack.c.l.b16 %v885_v27  ;;  %v981_v34 = vld [vmem:[#allocation4] sm:$0xf] }
  0xec   : > { %889 = vrot.lane.b32.xlu1 %v888_v37, %s1893_s17  ;;  %v1044_v37 = vunpack.c.l.b16 %v981_v34 }
  0xed   : > { %793 = vrot.lane.b32.xlu0 %v792_v39, %s1894_s22  ;;  %v949_v31 = vpack.c.b16 %v948_v30, %v948_v30 }
  0xee   : > { %v1045_v41 = vpack.c.b16 %v1044_v37, %v1044_v37 }
 0x13d   : > { %v991_v43 = vpop.permute.xlu2 %990 }
 0x13e   : > { %v996_v49 = vsel %vm712_vm2, %v991_v43, 0 }
 0x145   : > { %v986_v54 = vpop.permute.xlu2 %985 }
 0x156   : > { %v895_v44 = vpop.permute.xlu1 %894 }
 0x157   : > { %v799_v45 = vpop.permute.xlu0 %798  ;;  %v900_v46 = vsel %vm712_vm2, %v895_v44, 0 }
 0x158   : > { %v804_v47 = vsel %vm712_vm2, %v799_v45, 0  ;;  %909 = vmatpush.bf16.xpose.msrb.mxu3 %v900_v46 }
 0x159   : > { %813 = vmatpush.bf16.xpose.msrb.mxu1 %v804_v47 }
 0x15e   : > { %v890_v50 = vpop.permute.xlu1 %889 }
 0x15f   : > { %v794_v51 = vpop.permute.xlu0 %793  ;;  %1394 = vmatmul.msk.bf16.vlgmr.msrb.gmra.mxu3 %vm712_vm2, %v890_v50 }
 0x160   : > { %1392 = vmatmul.msk.bf16.vlgmr.msrb.gmra.mxu1 %vm712_vm2, %v794_v51 }
 0x161   : > { %1005 = vmatpush.bf16.xpose.msra.mxu1 %v996_v49 }
 0x169   : > { %v2173_v52 = vpop.f32.mrf.mxu3 }
 0x16a   : > { %v733_v53 = vsel %vm712_vm2, %v2173_v52, -inf }
 0x16b   : > { %734 = vmax.xlane.f32.xlu0 %v733_v53 }
 0x170   : > { %1396 = vmatmul.msk.bf16.vlgmr.msra.gmra.mxu1 %vm712_vm2, %v986_v54 }
 0x171   : > { %v730_v55 = vpop.f32.mrf.mxu3 }
 0x1dd   : > { %v2183_v60 = vpop.f32.mrf.mxu1 }
 0x1de   : > { %v820_v61 = vsel %vm712_vm2, %v2183_v60, -inf  ;;  %v735_v0 = vpop.xlane.xlu0 %734 }
 0x1df   : > { %821 = vmax.xlane.f32.xlu1 %v820_v61  ;;  %v2190_v2 = vmax.f32 %v2187_v62, %v735_v0 }
 0x1e1   : > { %v737_v5 = vsub.f32 %v2187_v62, %v2190_v2  ;;  %786 = vst.msk [vmem:[#allocation6] sm:$0xff] %vm754_vm4, %v2190_v2 }
 0x1e2   : > { %v2192_v3 = vpop.f32.mrf.mxu3 }
 0x1e3   : > { %v916_v6 = vsel %vm712_vm2, %v2192_v3, -inf }
 0x1e4   : > { %917 = vmax.xlane.f32.xlu2 %v916_v6 }
 0x1e5   : > { %v817_v7 = vpop.f32.mrf.mxu1 }
 0x1e8   : > { %v2211_v22 = vld [vmem:[#allocation6] sm:$0xff] }
 0x1ea   : > { %v913_v9 = vpop.f32.mrf.mxu3 }
 0x1ed   : > { %v2201_v10 = vpop.f32.mrf.mxu1 }
 0x1ee   : > { %v1012_v11 = vsel %vm712_vm2, %v2201_v10, -inf }
 0x1ef   : > { %1013 = vmax.xlane.f32.xlu2 %v1012_v11 }
 0x1f5   : > { %v1009_v12 = vpop.f32.mrf.mxu1 }
 0x1f6   : > { %v748_v12 = vld [vmem:[#allocation7] sm:$0xff] }
 0x1f8   : > { %742 = vperm.xlu1 %1547, %v2190_v2  }
 0x200   : > { %1548 = vset.pattern.permute.xlu1 %v1899_v16 }
 0x207   : > { %854 = vrot.lane.b32.xlu2 %v853_v17, %s1894_s22 }
 0x252   : > { %v822_v21 = vpop.xlane.xlu1 %821 }
 0x253   : > { %v2214_v23 = vmax.f32 %v2211_v22, %v822_v21 }
 0x255   : > { %v824_v24 = vsub.f32 %v2211_v22, %v2214_v23  ;;  %882 = vst.msk [vmem:[#allocation6] sm:$0xff] %vm841_vm6, %v2214_v23  ;;  %829 = vperm.xlu0 %1546, %v2214_v23  }
 0x257   : > { %v918_v26 = vpop.xlane.xlu2 %917  ;;  %v825_v9 = vmul.f32 1.442695, %v824_v24 }
 0x25c   : > { %v2221_v25 = vld [vmem:[#allocation6] sm:$0xff] }
 0x25d   : > { %v2224_v28 = vmax.f32 %v2221_v25, %v918_v26  ;;  %1554 = vset.pattern.permute.xlu0 %v1897_v58 }
 0x25f   : > { %v920_v29 = vsub.f32 %v2221_v25, %v2224_v28  ;;  %978 = vst.msk [vmem:[#allocation6] sm:$0xff] %vm937_vm7, %v2224_v28  ;;  %925 = vperm.xlu1 %1548, %v2224_v28  }
 0x262   : > { %v1014_v33 = vpop.xlane.xlu2 %1013 }
 0x266   : > { %v2232_v32 = vld [vmem:[#allocation6] sm:$0xff] }
 0x267   : > { %v2235_v35 = vmax.f32 %v2232_v32, %v1014_v33  ;;  %950 = vrot.lane.b32.xlu1 %v949_v31, %s1893_s17 }
 0x268   : > { %1550 = vset.pattern.permute.xlu1 %v1897_v58 }
 0x269   : > { %v1016_v36 = vsub.f32 %v2232_v32, %v2235_v35  ;;  %1074 = vst.msk [vmem:[#allocation6] sm:$0xff] %vm1033_vm8, %v2235_v35  ;;  %1021 = vperm.xlu2 %1549, %v2235_v35   ;;  %v756_v32 = vld [vmem:[#allocation5] sm:$0xff] }
 0x26a   : > { %v743_v38 = vpop.permute.xlu1 %742  ;;  %v855_v45 = vpop.permute.xlu2 %854 }
 0x26b   : > { %v745_v39 = vsub.f32 %v2173_v52, %v743_v38  ;;  %v860_v46 = vsel %vm767_vm5, %v855_v45, 0  ;;  %v1017_v15 = vmul.f32 1.442695, %v1016_v36 }
 0x26c   : > { %869 = vmatpush.bf16.msrb.mxu2 %v860_v46 }
 0x26d   : > { %v746_v40 = vmul.f32 1.442695, %v745_v39 }
 0x26f   : > { %1562 = vpow2.f32 %v746_v40 }
 0x271   : > { %1046 = vrot.lane.b32.xlu2 %v1045_v41, %s1892_s16 }
 0x272   : > { %1551 = vset.pattern.permute.xlu2 %v1898_v13 }
 0x275   : > { %v1563_v42 = vpop.eup %1562 }
 0x276   : > { %v763_v43 = vpack.c.bf16 %v1563_v42, %v1563_v42  ;;  %v750_v44 = vsel %vm712_vm2, %v1563_v42, 0.0 }
 0x278   : > { %1391 = vmatmul.msk.bf16.vlgmr.msrb.gmra.mxu0 %vm712_vm2, %v763_v43 }
 0x27f   : > { %751 = vadd.xlane.f32.xlu0 %v750_v44 }
 0x2c3   : > { %v1022_v47 = vpop.permute.xlu2 %1021 }
 0x2c4   : > { %v1024_v48 = vsub.f32 %v2201_v10, %v1022_v47  ;;  %v921_v10 = vmul.f32 1.442695, %v920_v29 }
 0x2c6   : > { %v1025_v49 = vmul.f32 1.442695, %v1024_v48 }
 0x2c7   : > { %v830_v50 = vpop.permute.xlu0 %829 }
 0x2c8   : > { %1564 = vpow2.f32 %v1025_v49  ;;  %v832_v51 = vsub.f32 %v2183_v60, %v830_v50 }
 0x2ca   : > { %v833_v52 = vmul.f32 1.442695, %v832_v51 }
 0x2cb   : > { %v1047_v53 = vpop.permute.xlu2 %1046 }
 0x2cc   : > { %1566 = vpow2.f32 %v833_v52  ;;  %v1052_v54 = vsel %vm767_vm5, %v1047_v53, 0 }
 0x2cd   : > { %1061 = vmatpush.bf16.msra.mxu2 %v1052_v54 }
 0x2ce   : > { %v1565_v55 = vpop.eup %1564 }
 0x2cf   : > { %v1029_v56 = vsel %vm712_vm2, %v1565_v55, 0.0  ;;  %v1042_v8 = vpack.c.bf16 %v1565_v55, %v1565_v55 }
 0x2d0   : > { %1030 = vadd.xlane.f32.xlu0 %v1029_v56 }
 0x2d1   : > { %v926_v57 = vpop.permute.xlu1 %925 }
 0x2d2   : > { %v1567_v58 = vpop.eup %1566  ;;  %v928_v59 = vsub.f32 %v2192_v3, %v926_v57  ;;  %v738_v3 = vmul.f32 1.442695, %v737_v5 }
 0x2d3   : > { %v837_v61 = vsel %vm712_vm2, %v1567_v58, 0.0  ;;  %v850_v63 = vpack.c.bf16 %v1567_v58, %v1567_v58 }
 0x2d4   : > { %v929_v0 = vmul.f32 1.442695, %v928_v59  ;;  %838 = vadd.xlane.f32.xlu1 %v837_v61 }
 0x2d5   : > { %1393 = vmatmul.msk.bf16.vlgmr.msrb.gmra.mxu2 %vm712_vm2, %v850_v63  ;;  %v1418_v63 = vld [vmem:[#allocation19 + $0x8] sm:$0xff] }
 0x2d6   : > { %1568 = vpow2.f32 %v929_v0  ;;  %1149 = vmatpush.bf16.msra.mxu3 %v1418_v63  ;;  %v1417_v0 = vld [vmem:[#allocation19] sm:$0xff] }
 0x2d7   : > { %1570 = vpow2.f32 %v738_v3 }
 0x2d8   : > { %1572 = vpow2.f32 %v825_v9 }
 0x2d9   : > { %v951_v60 = vpop.permute.xlu1 %950  ;;  %1574 = vpow2.f32 %v921_v10 }
 0x2da   : > { %v956_v1 = vsel %vm767_vm5, %v951_v60, 0  ;;  %1576 = vpow2.f32 %v1017_v15  ;;  %1150 = vmatpush.bf16.msra.mxu3 %v1417_v0 }
 0x2db   : > { %965 = vmatpush.bf16.msra.mxu0 %v956_v1 }
 0x2dc   : > { %v1569_v4 = vpop.eup %1568 }
 0x2dd   : > { %v946_v6 = vpack.c.bf16 %v1569_v4, %v1569_v4  ;;  %v933_v7 = vsel %vm712_vm2, %v1569_v4, 0.0  ;;  %v1571_v11 = vpop.eup %1570 }
 0x2de   : > { %934 = vadd.xlane.f32.xlu2 %v933_v7  ;;  %v749_v14 = vmul.f32 %v1571_v11, %v748_v12  ;;  %v1573_v5 = vpop.eup %1572 }
 0x2df   : > { %1395 = vmatmul.msk.bf16.vlgmr.msra.gmra.mxu0 %vm712_vm2, %v946_v6  ;;  %v1575_v17 = vpop.eup %1574 }
 0x2e0   : > { %v1577_v21 = vpop.eup %1576 }
 0x2e5   : > { %1397 = vmatmul.msk.bf16.vlgmr.msra.gmra.mxu2 %vm712_vm2, %v1042_v8 }
 0x2ed   : > { %759 = vperm.xlu1 %1550, %v1571_v11  }
 0x2f2   : > { %v752_v62 = vpop.xlane.xlu0 %751 }
 0x2f3   : > { %v753_v2 = vadd.f32 %v752_v62, %v749_v14  ;;  %v1561_v14 = vld [vmem:[%s2390_s27] ss:$0 sm:$0xff] }
 0x2f5   : > { %755 = vst.msk [vmem:[#allocation7] sm:$0xff] %vm754_vm4, %v753_v2  ;;  %v780_v19 = vpop.f32.mrf.mxu0  ;;  %1552 = vset.pattern.permute.xlu1 %v1899_v16 }
 0x2f6   : > { %942 = vperm.xlu1 %1552, %v1575_v17   ;;  %846 = vperm.xlu2 %1551, %v1573_v5  }
 0x2fc   : > { %v835_v22 = vld [vmem:[#allocation7] sm:$0xff] }
 0x2fd   : > { %v782_v20 = vpop.f32.mrf.mxu0  ;;  %v836_v23 = vmul.f32 %v1573_v5, %v835_v22 }
 0x2fe   : > { %1553 = vset.pattern.permute.xlu2 %v1900_v18 }
 0x2ff   : > { %1038 = vperm.xlu2 %1553, %v1577_v21  }
 0x307   : > { %1555 = vset.pattern.permute.xlu2 %v1898_v13 }
 0x343   : > { %v1031_v13 = vpop.xlane.xlu0 %1030 }
 0x347   : > { %v839_v24 = vpop.xlane.xlu1 %838 }
 0x348   : > { %v840_v25 = vadd.f32 %v839_v24, %v836_v23 }
 0x34a   : > { %842 = vst.msk [vmem:[#allocation7] sm:$0xff] %vm841_vm6, %v840_v25 }
 0x351   : > { %v931_v26 = vld [vmem:[#allocation7] sm:$0xff]  ;;  %v935_v28 = vpop.xlane.xlu2 %934 }
 0x352   : > { %v932_v27 = vmul.f32 %v1575_v17, %v931_v26 }
 0x354   : > { %v936_v16 = vadd.f32 %v935_v28, %v932_v27 }
 0x356   : > { %938 = vst.msk [vmem:[#allocation7] sm:$0xff] %vm937_vm7, %v936_v16 }
 0x358   : > { %v871_v29 = vpop.f32.mrf.mxu2 }
 0x359   : > { %876 = vrot.lane.b32.xlu0 %v871_v29, %s1901_s10  ;;  %v847_v45 = vpop.permute.xlu2 %846 }
 0x35c   : > { %v967_v30 = vpop.f32.mrf.mxu0 }
 0x35d   : > { %v1027_v31 = vld [vmem:[#allocation7] sm:$0xff] }
 0x35e   : > { %v1028_v33 = vmul.f32 %v1577_v21, %v1027_v31 }
 0x35f   : > { %v760_v34 = vpop.permute.xlu1 %759 }
 0x360   : > { %v1032_v35 = vadd.f32 %v1031_v13, %v1028_v33  ;;  %v762_v36 = vmul.f32 %v760_v34, %v756_v32  ;;  %v873_v37 = vpop.f32.mrf.mxu2 }
 0x361   : > { %972 = vrot.lane.b32.xlu0 %v967_v30, %s1902_s12  ;;  %v1039_v54 = vpop.permute.xlu2 %1038 }
 0x362   : > { %1034 = vst.msk [vmem:[#allocation7] sm:$0xff] %vm1033_vm8, %v1032_v35  ;;  %v784_v38 = vadd.f32 %v780_v19, %v762_v36 }
 0x364   : > { %785 = vst.msk [vmem:[#allocation5] sm:$0xff] %vm712_vm2, %v784_v38  ;;  %v969_v39 = vpop.f32.mrf.mxu0 }
 0x368   : > { %v1063_v40 = vpop.f32.mrf.mxu2  ;;  %v943_v49 = vpop.permute.xlu1 %942 }
 0x369   : > { %1068 = vrot.lane.b32.xlu1 %v1063_v40, %s1903_s28  ;;  %v1098_v41 = vld [vmem:[#allocation7] sm:$0xff] }
 0x36a   : > { %1578 = vrcp.f32 %v1098_v41 }
 0x36b   : > { %v843_v44 = vld [vmem:[#allocation5] sm:$0xff] }
 0x36c   : > { %v849_v46 = vmul.f32 %v847_v45, %v843_v44 }
 0x370   : > { %v1579_v42 = vpop.eup %1578  ;;  %v1065_v43 = vpop.f32.mrf.mxu2 }
 0x371   : > { %1103 = vperm.xlu1 %1552, %v1579_v42   ;;  %1093 = vperm.xlu2 %1555, %v1579_v42  }
 0x372   : > { %1083 = vperm.xlu0 %1554, %v1579_v42  }
 0x379   : > { %1556 = vset.pattern.permute.xlu2 %v1900_v18 }
 0x37a   : > { %1113 = vperm.xlu2 %1556, %v1579_v42   ;;  %1557 = vset.pattern.permute.xlu0 %v1900_v18 }
 0x3cb   : > { %v877_v47 = vpop.permute.xlu0 %876  ;;  %v1094_v60 = vpop.permute.xlu2 %1093 }
 0x3cc   : > { %v879_v48 = vadd.f32 %v877_v47, %v849_v46 }
 0x3ce   : > { %881 = vst.msk [vmem:[#allocation5] sm:$0xff] %vm880_vm9, %v879_v48 }
 0x3d3   : > { %v973_v52 = vpop.permute.xlu0 %972 }
 0x3d4   : > { %v1114_v8 = vpop.permute.xlu2 %1113 }
 0x3d5   : > { %v939_v50 = vld [vmem:[#allocation5] sm:$0xff] }
 0x3d6   : > { %v945_v51 = vmul.f32 %v943_v49, %v939_v50 }
 0x3d8   : > { %v975_v53 = vadd.f32 %v973_v52, %v945_v51 }
 0x3da   : > { %977 = vst.msk [vmem:[#allocation5] sm:$0xff] %vm976_vm10, %v975_v53 }
 0x3db   : > { %v1069_v18 = vpop.permute.xlu1 %1068 }
 0x3e1   : > { %v1035_v55 = vld [vmem:[#allocation5] sm:$0xff] }
 0x3e2   : > { %v1041_v56 = vmul.f32 %v1039_v54, %v1035_v55 }
 0x3e3   : > { %v1104_v6 = vpop.permute.xlu1 %1103 }
 0x3e4   : > { %v1071_v57 = vadd.f32 %v1069_v18, %v1041_v56  ;;  %v1084_v58 = vpop.permute.xlu0 %1083 }
 0x3e6   : > { %1073 = vst.msk [vmem:[#allocation5] sm:$0xff] %vm1072_vm11, %v1071_v57 }
 0x3ed   : > { %v1080_v59 = vld [vmem:[#allocation5] sm:$0xff] }
 0x3ee   : > { %v1086_v61 = vmul.f32 %v1084_v58, %v1080_v59 }
 0x3f0   : > { %1087 = vst.msk [vmem:[#allocation5] sm:$0xff] %vm712_vm2, %v1086_v61 }
 0x3f7   : > { %v1090_v1 = vld [vmem:[#allocation5] sm:$0xff] }
 0x3f8   : > { %v1096_v4 = vmul.f32 %v1094_v60, %v1090_v1 }
 0x3fa   : > { %1097 = vst.msk [vmem:[#allocation5] sm:$0xff] %vm880_vm9, %v1096_v4 }
 0x401   : > { %v1100_v7 = vld [vmem:[#allocation5] sm:$0xff] }
 0x402   : > { %v1106_v3 = vmul.f32 %v1104_v6, %v1100_v7 }
 0x404   : > { %1107 = vst.msk [vmem:[#allocation5] sm:$0xff] %vm976_vm10, %v1106_v3 }
 0x40b   : > { %v1110_v9 = vld [vmem:[#allocation5] sm:$0xff] }
 0x40c   : > { %v1116_v10 = vmul.f32 %v1114_v8, %v1110_v9 }
 0x40e   : > { %1117 = vst.msk [vmem:[#allocation5] sm:$0xff] %vm1072_vm11, %v1116_v10 }
 0x415   : > { %v1118_v11 = vld [vmem:[#allocation5] sm:$0xff] }
 0x416   : > { %v1119_v12 = vpack.c.bf16 %v1118_v11, %v1118_v11 }
 0x418   : > { %1406 = vmatmul.msk.bf16.vlgmr.msra.gmra.mxu3 %vm602_vm0, %v1119_v12 }
 0x49b   : > { %v1152_v62 = vpop.f32.mrf.mxu3 }
 0x49c   : > { %v1153_v2 = vadd.f32 %v1561_v14, %v1152_v62 }
 0x49e   : > { %1156 = vst.msk [vmem:[%s574_s24] sm:$0xff] %vm602_vm0, %v1153_v2 }
 0x49f   : > { %1817 = shalt.err (!%p1814_p13)
}
 0x4a0   : > { %1441 = dma.vmem_to_hbm [thread:$0]  (%p2052_p2), %s1172_s14, 128, %s1174_s23, %s1158_s29  }
 0x4a3   : > { %v1154_v5 = vpop.f32.mrf.mxu3 }
 0x4a4 PF: > { %s2391_s15 = sld [smem:[#allocation26_spill]]  ;;  %p1467_p0 = pnand %p1347_p6, %p2059_p7 }
 0x4a5   : > { %s2393_s10 = sld [smem:[#allocation28_spill]] }
 0x4a6   : > { %p1468_p4 = pneg %p1467_p0 }
 0x4aa   : > { %s1185_s12 = sand.u32 1, %s2391_s15  }
 0x4ab   : > { %s1186_s28 = scalar_lea.sflag [#allocation10], %s1185_s12 }
 0x4ac   : > { %1859 = dma.done.wait (%p1468_p4), %s1186_s28, 128  }
 0x4ad   : > { %1861 = vsyncadd (%p1468_p4), %s1186_s28, 4294967168  ;;  %s32_s22 = sadd.s32 1, %s2393_s10   ;;  %s2394_s21 = sld [smem:[#allocation31_spill]] }
 0x4ae   : > { %p29_p9 = scmp.ge.s32.totalorder %s32_s22, 4   ;;  %s2395_s20 = sld [smem:[#allocation27_spill]] }
 0x4af   : > { %s2396_s26 = sld [smem:[#allocation29_spill]]  ;;  %s2397_s17 = smov %s1868_s18 }
 0x4b0   : > { %s2398_s18 = smov %s1872_s19 }
 0x4b1   :  { %31 = sbr.rel (!%p29_p9) target bundleno = 18 (0x12), region = 157 }
 0x4b3   : > { %s2399_s19 = smov %s2394_s21 }
 0x4b5   : > { %s2400_s21 = smov %s2396_s26 }
 0x4b6   :  { %1192 = vsyncpa [#allocation9], 1 }
 0x4b7   :  { %1194 = vsyncpa [#allocation9 + $0x1], 1 }
 0x4b8   :  { %1195 = vsyncpa [#allocation12], 1 }
 0x4b9   :  { %1197 = vsyncpa [#allocation12 + $0x1], 1 }
 0x4ba   :  { %1198 = vsyncpa [#allocation15], 1 }
 0x4bb   :  { %1199 = vsyncpa [#allocation18], 1 }
 0x4bc   :  { %1200 = vsyncpa [#allocation10], 1 }
 0x4bd   :  { %1202 = vsyncpa [#allocation10 + $0x1], 1 }

</bundles_post_ra>
